<compile_context>
chip_gen: v7x
topology: tpu7x:2x2x1
jax: 0.10.0
libtpu: 0.0.40
codegen_flags: <defaults>
</compile_context>

<pallas_src>
import functools

import jax
import jax.numpy as jnp
from jax import lax
from jax.experimental import pallas as pl
from jax.experimental.pallas import tpu as pltpu


def _contrastive_kernel(q_ref, k_ref, mask_ref, lse_ref, ps_ref,
                        m_s, l_s, ps_s,
                        *, b_valid, b_pad, keys_resident):
    i = pl.program_id(0)              # row tile    ("parallel")
    j = pl.program_id(1)              # column tile ("arbitrary", innermost)
    nj = pl.num_programs(1)
    T = q_ref.shape[0]
    padded = b_pad != b_valid         # static Python bool

    @pl.when(j == 0)
    def _init():
        m_s[...] = jnp.full_like(m_s, -jnp.inf)
        l_s[...] = jnp.zeros_like(l_s)
        ps_s[...] = jnp.zeros_like(ps_s)

    q = q_ref[...]                    # (T, Dp), already normalized * 1/temperature
    if keys_resident:
        start = pl.multiple_of(j * T, 128)
        k = k_ref[pl.ds(start, T), :]     # slice the VMEM-resident key panel
    else:
        k = k_ref[...]                    # (T, Dp) streamed key tile

    # (T, T) logits tile on the MXU with f32 accumulation.
    sim = lax.dot_general(q, k, (((1,), (1,)), ((), ())),
                          preferred_element_type=jnp.float32)

    # Positive-pair numerator: the mask already has the diagonal removed and zero padding,
    # so the raw sim can be used directly.
    ps_s[...] += jnp.sum(jnp.where(mask_ref[...] != 0, sim, 0.0), axis=1, keepdims=True)

    if padded:
        is_edge = jnp.logical_or(i == j, j == nj - 1)
    else:
        is_edge = i == j

    @pl.when(jnp.logical_not(is_edge))
    def _plain_tile():                # nothing to exclude in this tile: lean LSE update
        m_prev = m_s[...]
        m_new = jnp.maximum(m_prev, jnp.max(sim, axis=1, keepdims=True))
        alpha = jnp.exp(m_prev - m_new)
        l_s[...] = alpha * l_s[...] + jnp.sum(jnp.exp(sim - m_new), axis=1, keepdims=True)
        m_s[...] = m_new

    @pl.when(is_edge)
    def _edge_tile():                 # mask the diagonal and/or zero-padded columns
        rr = lax.broadcasted_iota(jnp.int32, (T, T), 0)
        cc = lax.broadcasted_iota(jnp.int32, (T, T), 1)
        excl = (rr - cc) == (j - i) * T
        if padded:
            excl = jnp.logical_or(excl, (j * T + cc) >= b_valid)
        sim_l = jnp.where(excl, -jnp.inf, sim)
        m_prev = m_s[...]
        m_new = jnp.maximum(m_prev, jnp.max(sim_l, axis=1, keepdims=True))
        row_ok = m_new > -jnp.inf     # guards the degenerate all-excluded row (B == 1)
        alpha = jnp.where(row_ok, jnp.exp(m_prev - m_new), 0.0)
        psum = jnp.sum(jnp.exp(sim_l - m_new), axis=1, keepdims=True)
        l_s[...] = alpha * l_s[...] + jnp.where(row_ok, psum, 0.0)
        m_s[...] = m_new

    @pl.when(j == nj - 1)
    def _finalize():
        lse_ref[...] = m_s[...] + jnp.log(l_s[...])
        ps_ref[...] = ps_s[...]


def _round_up(x, m):
    return ((x + m - 1) // m) * m


@functools.partial(jax.jit,
                   static_argnames=("temperature", "block_size",
                                    "use_bf16_matmul", "keys_resident"))
def contrastive_loss(embeddings, positives_mask, temperature=0.1,
                     block_size=512, use_bf16_matmul=False, keys_resident=None):
    """embeddings: [B, D] float; positives_mask: [B, B] bool/0-1. Returns scalar loss."""
    emb = jnp.asarray(embeddings, jnp.float32)
    B, D = emb.shape
    mask_b = jnp.asarray(positives_mask).astype(bool)
    inv_temp = 1.0 / float(temperature)

    # ---- cheap streaming prologue in plain XLA (runs once) -----------------------------
    # L2 row-normalize (matches F.normalize eps=1e-12); fold 1/temperature into the query
    # copy so the kernel does zero per-tile normalization / scaling work.
    inv_norm = lax.rsqrt(jnp.maximum(jnp.sum(emb * emb, axis=1, keepdims=True), 1e-24))
    k_norm = emb * inv_norm
    q_scaled = k_norm * inv_temp
    # The diagonal is never a positive pair; positive counts depend only on the mask, so
    # compute them here instead of re-deriving them per tile inside the kernel.
    eye = jnp.eye(B, dtype=bool)
    mask_clean = jnp.logical_and(mask_b, jnp.logical_not(eye))
    pcnt = jnp.sum(mask_clean, axis=1).astype(jnp.float32)

    # ---- tile geometry ------------------------------------------------------------------
    Dp = _round_up(D, 128)
    B128 = _round_up(B, 128)
    T = max(128, min((int(block_size) // 128) * 128, B128))
    half = ((B128 // 2) // 128) * 128
    if half >= 128 and T > half:
        T = half                      # keep >= 2 row tiles so both v7x TensorCores get work
    Bp = _round_up(B, T)              # padding confined to the last row / column tile

    op_dtype = jnp.bfloat16 if use_bf16_matmul else jnp.float32
    op_size = jnp.dtype(op_dtype).itemsize
    q_p = jnp.pad(q_scaled, ((0, Bp - B), (0, Dp - D))).astype(op_dtype)
    k_p = jnp.pad(k_norm, ((0, Bp - B), (0, Dp - D))).astype(op_dtype)
    mask_p = jnp.pad(mask_clean.astype(jnp.int8), ((0, Bp - B), (0, Bp - B)))

    # ---- VMEM budget: leave headroom under the physical per-core capacity ---------------
    # (64 MiB/TC on v7x, 128 MiB on v5e/v6e).
    try:
        vmem_cap = int(pltpu.get_tpu_info().vmem_capacity_bytes)
    except Exception:
        vmem_cap = 64 * 1024 * 1024
    vmem_limit = max(32 * 1024 * 1024, vmem_cap - 16 * 1024 * 1024)

    if keys_resident is None:
        # Keep the whole key panel VMEM-resident (DMA'd from HBM once) when it fits the
        # budget, accounting for double-buffering, the streamed q / mask tiles, the (T,T)
        # in-flight temporaries and compiler scratch.
        need = (2 * Bp * Dp * op_size       # key panel (double-buffered worst case)
                + 2 * T * Dp * op_size      # query tiles
                + 2 * T * T                 # int8 mask tiles
                + 4 * T * T * 4             # (T,T) f32 temporaries
                + 8 * 1024 * 1024)          # headroom / internal scratch
        keys_resident = bool(need <= vmem_limit)

    if keys_resident:
        k_spec = pl.BlockSpec((Bp, Dp), lambda i, j: (0, 0))    # fetched once, stays resident
    else:
        k_spec = pl.BlockSpec((T, Dp), lambda i, j: (j, 0))     # streamed per column tile

    kernel = functools.partial(_contrastive_kernel, b_valid=B, b_pad=Bp,
                               keys_resident=keys_resident)

    grid = (Bp // T, Bp // T)
    lse_p, ps_p = pl.pallas_call(
        kernel,
        out_shape=(jax.ShapeDtypeStruct((Bp, 1), jnp.float32),
                   jax.ShapeDtypeStruct((Bp, 1), jnp.float32)),
        grid_spec=pltpu.PrefetchScalarGridSpec(
            num_scalar_prefetch=0,
            grid=grid,
            in_specs=[
                pl.BlockSpec((T, Dp), lambda i, j: (i, 0)),     # normalized * 1/temp queries
                k_spec,                                         # normalized keys
                pl.BlockSpec((T, T), lambda i, j: (i, j)),      # int8 positives-mask tile
            ],
            out_specs=(pl.BlockSpec((T, 1), lambda i, j: (i, 0)),
                       pl.BlockSpec((T, 1), lambda i, j: (i, 0))),
            scratch_shapes=[pltpu.VMEM((T, 1), jnp.float32)] * 3,   # m, l, sum(pos*sim)
        ),
        compiler_params=pltpu.CompilerParams(
            dimension_semantics=("parallel", "arbitrary"),
            vmem_limit_bytes=int(vmem_limit),
        ),
    )(q_p, k_p, mask_p)

    # ---- O(B) epilogue: per-row loss = P_i * lse_i - sum_pos sim_ij (0 if no positives) --
    lse = lse_p[:B, 0]
    ps = ps_p[:B, 0]
    per_row = jnp.where(pcnt > 0.0, pcnt * lse - ps, 0.0)
    return jnp.sum(per_row) / jnp.float32(B)


def contrastive_loss_ref(embeddings, positives_mask, temperature=0.1):
    """Pure-JAX reference (direct translation of the PyTorch semantics)."""
    x = embeddings.astype(jnp.float32)
    B = x.shape[0]
    norm = jnp.sqrt(jnp.sum(x * x, axis=1, keepdims=True))
    x_n = x / jnp.maximum(norm, 1e-12)
    sim = (x_n @ x_n.T) / temperature
    eye = jnp.eye(B, dtype=bool)
    sim = jnp.where(eye, -jnp.inf, sim)
    m = jnp.max(sim, axis=1, keepdims=True)
    lse = m + jnp.log(jnp.sum(jnp.exp(sim - m), axis=1, keepdims=True))
    pos = positives_mask.astype(bool) & ~eye
    per_elem = jnp.where(pos, lse - sim, 0.0)
    return jnp.sum(per_elem) / B


if __name__ == "__main__":
    key = jax.random.PRNGKey(0)
    k1, k2, k3 = jax.random.split(key, 3)

    # Small case consistent with the module: batch=8, embedding_dim=32.
    B, D = 8, 32
    embeddings = jax.random.normal(k1, (B, D), dtype=jnp.float32)
    labels = jnp.array([0, 0, 1, 1, 2, 2, 3, 4], dtype=jnp.int32)
    positives_mask = (labels[:, None] == labels[None, :]) & (~jnp.eye(B, dtype=bool))

    loss = contrastive_loss(embeddings, positives_mask, temperature=0.1)
    jax.block_until_ready(loss)
    ref = contrastive_loss_ref(embeddings, positives_mask, temperature=0.1)
    assert jnp.allclose(loss, ref, rtol=1e-4, atol=1e-4), (loss, ref)

    # Multi-tile case: exercises the 2-D grid, online LSE across column tiles, the
    # gated edge/plain tile branches and row/column padding.
    B2, D2 = 260, 96
    emb2 = jax.random.normal(k2, (B2, D2), dtype=jnp.float32)
    lab2 = jax.random.randint(k3, (B2,), 0, 20)
    mask2 = (lab2[:, None] == lab2[None, :]) & (~jnp.eye(B2, dtype=bool))
    ref2 = contrastive_loss_ref(emb2, mask2, temperature=0.1)

    loss2 = contrastive_loss(emb2, mask2, temperature=0.1)          # auto (resident keys)
    jax.block_until_ready(loss2)
    assert jnp.allclose(loss2, ref2, rtol=1e-4, atol=1e-4), (loss2, ref2)

    loss2s = contrastive_loss(emb2, mask2, temperature=0.1,
                              keys_resident=False)                  # streamed key tiles
    jax.block_until_ready(loss2s)
    assert jnp.allclose(loss2s, ref2, rtol=1e-4, atol=1e-4), (loss2s, ref2)

    loss2b = contrastive_loss(emb2, mask2, temperature=0.1,
                              use_bf16_matmul=True)                 # bf16 MXU operands
    jax.block_until_ready(loss2b)
    assert jnp.allclose(loss2b, ref2, rtol=1e-1, atol=1e-1), (loss2b, ref2)

    print("KERNEL_OK")
</pallas_src>

<mosaic_0001>
module attributes {stable_mosaic.version = 11 : i64} {
  func.func @_contrastive_kernel(%arg0: i32, %arg1: i32, %arg2: memref<128x128xf32, #tpu.memory_space<vmem>>, %arg3: memref<128x128xf32, #tpu.memory_space<vmem>>, %arg4: memref<128x128xi8, #tpu.memory_space<vmem>>, %arg5: memref<128x1xf32, #tpu.memory_space<vmem>>, %arg6: memref<128x1xf32, #tpu.memory_space<vmem>>, %arg7: memref<128x1xf32, #tpu.memory_space<vmem>>, %arg8: memref<128x1xf32, #tpu.memory_space<vmem>>, %arg9: memref<128x1xf32, #tpu.memory_space<vmem>>) attributes {dimension_semantics = [#tpu.dimension_semantics<parallel>, #tpu.dimension_semantics<arbitrary>], iteration_bounds = array<i64: 1, 1>, scalar_prefetch = 0 : i64, scratch_operands = 3 : i64, tpu.core_type = #tpu.core_type<tc>, window_params = [{transform_indices = @transform_0, window_bounds = array<i64: 128, 128>}, {pipeline_mode = #tpu.pipeline_mode<synchronous>, transform_indices = @transform_1, window_bounds = array<i64: 128, 128>}, {transform_indices = @transform_2, window_bounds = array<i64: 128, 128>}, {transform_indices = @transform_3, window_bounds = array<i64: 128, 1>}, {transform_indices = @transform_4, window_bounds = array<i64: 128, 1>}]} {
    %c0_i32 = arith.constant 0 : i32
    %0 = arith.cmpi eq, %arg1, %c0_i32 : i32
    %1 = arith.extui %0 : i1 to i32
    %c0_i32_0 = arith.constant 0 : i32
    %2 = arith.cmpi ne, %1, %c0_i32_0 : i32
    scf.if %2 {
      %cst_16 = arith.constant 0xFF800000 : f32
      %30 = vector.broadcast %cst_16 : f32 to vector<128x1xf32>
      %c0_17 = arith.constant 0 : index
      %c0_18 = arith.constant 0 : index
      %31 = vector.load %arg7[%c0_17, %c0_18] : memref<128x1xf32, #tpu.memory_space<vmem>>, vector<128x1xf32>
      tpu.vector_store %arg7[%c0_17, %c0_18], %30 {strides = array<i32>} : memref<128x1xf32, #tpu.memory_space<vmem>>, vector<128x1xf32>,
      %cst_19 = arith.constant 0.000000e+00 : f32
      %32 = vector.broadcast %cst_19 : f32 to vector<128x1xf32>
      %c0_20 = arith.constant 0 : index
      %c0_21 = arith.constant 0 : index
      %33 = vector.load %arg8[%c0_20, %c0_21] : memref<128x1xf32, #tpu.memory_space<vmem>>, vector<128x1xf32>
      tpu.vector_store %arg8[%c0_20, %c0_21], %32 {strides = array<i32>} : memref<128x1xf32, #tpu.memory_space<vmem>>, vector<128x1xf32>,
      %cst_22 = arith.constant 0.000000e+00 : f32
      %34 = vector.broadcast %cst_22 : f32 to vector<128x1xf32>
      %c0_23 = arith.constant 0 : index
      %c0_24 = arith.constant 0 : index
      %35 = vector.load %arg9[%c0_23, %c0_24] : memref<128x1xf32, #tpu.memory_space<vmem>>, vector<128x1xf32>
      tpu.vector_store %arg9[%c0_23, %c0_24], %34 {strides = array<i32>} : memref<128x1xf32, #tpu.memory_space<vmem>>, vector<128x1xf32>,
    } else {
    }
    %c0 = arith.constant 0 : index
    %c0_1 = arith.constant 0 : index
    %3 = vector.load %arg2[%c0, %c0_1] : memref<128x128xf32, #tpu.memory_space<vmem>>, vector<128x128xf32>
    %c128_i32 = arith.constant 128 : i32
    %4 = arith.muli %arg1, %c128_i32 : i32
    %5 = tpu.assume_multiple %4, 128 : i32
    %6 = arith.index_cast %5 : i32 to index
    %c0_2 = arith.constant 0 : index
    %7 = vector.load %arg3[%6, %c0_2] : memref<128x128xf32, #tpu.memory_space<vmem>>, vector<128x128xf32>
    %cst = arith.constant dense<0.000000e+00> : vector<128x128xf32>
    %8 = tpu.matmul %3, %7, %cst {dimension_numbers = #tpu.dot_dimension_numbers<[1], [1], [0], [0], [0, 0, 1, 0], [], []>} : vector<128x128xf32>, vector<128x128xf32>, vector<128x128xf32> -> vector<128x128xf32>
    %c0_3 = arith.constant 0 : index
    %c0_4 = arith.constant 0 : index
    %9 = vector.load %arg9[%c0_3, %c0_4] : memref<128x1xf32, #tpu.memory_space<vmem>>, vector<128x1xf32>
    %c0_5 = arith.constant 0 : index
    %c0_6 = arith.constant 0 : index
    %10 = vector.load %arg4[%c0_5, %c0_6] : memref<128x128xi8, #tpu.memory_space<vmem>>, vector<128x128xi8>
    %c0_i8 = arith.constant 0 : i8
    %11 = vector.broadcast %c0_i8 : i8 to vector<128x128xi8>
    %12 = arith.cmpi ne, %10, %11 : vector<128x128xi8>
    %cst_7 = arith.constant 0.000000e+00 : f32
    %13 = vector.broadcast %cst_7 : f32 to vector<128x128xf32>
    %14 = arith.select %12, %8, %13 : vector<128x128xi1>, vector<128x128xf32>
    %cst_8 = arith.constant dense<0.000000e+00> : vector<128xf32>
    %15 = vector.multi_reduction <add>, %14, %cst_8 [1] : vector<128x128xf32> to vector<128xf32>
    %16 = vector.shape_cast %15 : vector<128xf32> to vector<128x1xf32>
    %17 = arith.addf %9, %16 : vector<128x1xf32>
    %c0_9 = arith.constant 0 : index
    %c0_10 = arith.constant 0 : index
    %18 = vector.load %arg9[%c0_9, %c0_10] : memref<128x1xf32, #tpu.memory_space<vmem>>, vector<128x1xf32>
    tpu.vector_store %arg9[%c0_9, %c0_10], %17 {strides = array<i32>} : memref<128x1xf32, #tpu.memory_space<vmem>>, vector<128x1xf32>,
    %19 = arith.cmpi eq, %arg0, %arg1 : i32
    %c0_i32_11 = arith.constant 0 : i32
    %20 = arith.cmpi eq, %arg1, %c0_i32_11 : i32
    %21 = arith.ori %19, %20 : i1
    %true = arith.constant true
    %22 = arith.xori %21, %true : i1
    %23 = arith.extui %22 : i1 to i32
    %c0_i32_12 = arith.constant 0 : i32
    %24 = arith.cmpi ne, %23, %c0_i32_12 : i32
    scf.if %24 {
      %c0_16 = arith.constant 0 : index
      %c0_17 = arith.constant 0 : index
      %30 = vector.load %arg7[%c0_16, %c0_17] : memref<128x1xf32, #tpu.memory_space<vmem>>, vector<128x1xf32>
      %cst_18 = arith.constant dense<0xFF800000> : vector<128xf32>
      %31 = vector.multi_reduction <maximumf>, %8, %cst_18 [1] : vector<128x128xf32> to vector<128xf32>
      %32 = vector.shape_cast %31 : vector<128xf32> to vector<128x1xf32>
      %33 = arith.maximumf %30, %32 : vector<128x1xf32>
      %34 = arith.subf %30, %33 : vector<128x1xf32>
      %35 = math.exp %34 : vector<128x1xf32>
      %c0_19 = arith.constant 0 : index
      %c0_20 = arith.constant 0 : index
      %36 = vector.load %arg8[%c0_19, %c0_20] : memref<128x1xf32, #tpu.memory_space<vmem>>, vector<128x1xf32>
      %37 = arith.mulf %35, %36 : vector<128x1xf32>
      %38 = vector.broadcast %33 : vector<128x1xf32> to vector<128x128xf32>
      %39 = arith.subf %8, %38 : vector<128x128xf32>
      %40 = math.exp %39 : vector<128x128xf32>
      %cst_21 = arith.constant dense<0.000000e+00> : vector<128xf32>
      %41 = vector.multi_reduction <add>, %40, %cst_21 [1] : vector<128x128xf32> to vector<128xf32>
      %42 = vector.shape_cast %41 : vector<128xf32> to vector<128x1xf32>
      %43 = arith.addf %37, %42 : vector<128x1xf32>
      %c0_22 = arith.constant 0 : index
      %c0_23 = arith.constant 0 : index
      %44 = vector.load %arg8[%c0_22, %c0_23] : memref<128x1xf32, #tpu.memory_space<vmem>>, vector<128x1xf32>
      tpu.vector_store %arg8[%c0_22, %c0_23], %43 {strides = array<i32>} : memref<128x1xf32, #tpu.memory_space<vmem>>, vector<128x1xf32>,
      %c0_24 = arith.constant 0 : index
      %c0_25 = arith.constant 0 : index
      %45 = vector.load %arg7[%c0_24, %c0_25] : memref<128x1xf32, #tpu.memory_space<vmem>>, vector<128x1xf32>
      tpu.vector_store %arg7[%c0_24, %c0_25], %33 {strides = array<i32>} : memref<128x1xf32, #tpu.memory_space<vmem>>, vector<128x1xf32>,
    } else {
    }
    %25 = arith.extui %21 : i1 to i32
    %c0_i32_13 = arith.constant 0 : i32
    %26 = arith.cmpi ne, %25, %c0_i32_13 : i32
    scf.if %26 {
      %30 = tpu.iota {dimensions = array<i32: 0>} : vector<128x128xi32>
      %31 = tpu.iota {dimensions = array<i32: 1>} : vector<128x128xi32>
      %32 = arith.subi %30, %31 : vector<128x128xi32>
      %33 = arith.subi %arg1, %arg0 : i32
      %c128_i32_16 = arith.constant 128 : i32
      %34 = arith.muli %33, %c128_i32_16 : i32
      %35 = vector.broadcast %34 : i32 to vector<128x128xi32>
      %36 = arith.cmpi eq, %32, %35 : vector<128x128xi32>
      %c128_i32_17 = arith.constant 128 : i32
      %37 = arith.muli %arg1, %c128_i32_17 : i32
      %38 = vector.broadcast %37 : i32 to vector<128x128xi32>
      %39 = arith.addi %38, %31 : vector<128x128xi32>
      %c8_i32 = arith.constant 8 : i32
      %40 = vector.broadcast %c8_i32 : i32 to vector<128x128xi32>
      %41 = arith.cmpi sge, %39, %40 : vector<128x128xi32>
      %42 = arith.ori %36, %41 : vector<128x128xi1>
      %cst_18 = arith.constant 0xFF800000 : f32
      %43 = vector.broadcast %cst_18 : f32 to vector<128x128xf32>
      %44 = arith.select %42, %43, %8 : vector<128x128xi1>, vector<128x128xf32>
      %c0_19 = arith.constant 0 : index
      %c0_20 = arith.constant 0 : index
      %45 = vector.load %arg7[%c0_19, %c0_20] : memref<128x1xf32, #tpu.memory_space<vmem>>, vector<128x1xf32>
      %cst_21 = arith.constant dense<0xFF800000> : vector<128xf32>
      %46 = vector.multi_reduction <maximumf>, %44, %cst_21 [1] : vector<128x128xf32> to vector<128xf32>
      %47 = vector.shape_cast %46 : vector<128xf32> to vector<128x1xf32>
      %48 = arith.maximumf %45, %47 : vector<128x1xf32>
      %cst_22 = arith.constant 0xFF800000 : f32
      %49 = vector.broadcast %cst_22 : f32 to vector<128x1xf32>
      %50 = arith.cmpf ogt, %48, %49 : vector<128x1xf32>
      %51 = arith.subf %45, %48 : vector<128x1xf32>
      %52 = math.exp %51 : vector<128x1xf32>
      %cst_23 = arith.constant 0.000000e+00 : f32
      %53 = vector.broadcast %cst_23 : f32 to vector<128x1xf32>
      %54 = arith.select %50, %52, %53 : vector<128x1xi1>, vector<128x1xf32>
      %55 = vector.broadcast %48 : vector<128x1xf32> to vector<128x128xf32>
      %56 = arith.subf %44, %55 : vector<128x128xf32>
      %57 = math.exp %56 : vector<128x128xf32>
      %cst_24 = arith.constant dense<0.000000e+00> : vector<128xf32>
      %58 = vector.multi_reduction <add>, %57, %cst_24 [1] : vector<128x128xf32> to vector<128xf32>
      %59 = vector.shape_cast %58 : vector<128xf32> to vector<128x1xf32>
      %c0_25 = arith.constant 0 : index
      %c0_26 = arith.constant 0 : index
      %60 = vector.load %arg8[%c0_25, %c0_26] : memref<128x1xf32, #tpu.memory_space<vmem>>, vector<128x1xf32>
      %61 = arith.mulf %54, %60 : vector<128x1xf32>
      %cst_27 = arith.constant 0.000000e+00 : f32
      %62 = vector.broadcast %cst_27 : f32 to vector<128x1xf32>
      %63 = arith.select %50, %59, %62 : vector<128x1xi1>, vector<128x1xf32>
      %64 = arith.addf %61, %63 : vector<128x1xf32>
      %c0_28 = arith.constant 0 : index
      %c0_29 = arith.constant 0 : index
      %65 = vector.load %arg8[%c0_28, %c0_29] : memref<128x1xf32, #tpu.memory_space<vmem>>, vector<128x1xf32>
      tpu.vector_store %arg8[%c0_28, %c0_29], %64 {strides = array<i32>} : memref<128x1xf32, #tpu.memory_space<vmem>>, vector<128x1xf32>,
      %c0_30 = arith.constant 0 : index
      %c0_31 = arith.constant 0 : index
      %66 = vector.load %arg7[%c0_30, %c0_31] : memref<128x1xf32, #tpu.memory_space<vmem>>, vector<128x1xf32>
      tpu.vector_store %arg7[%c0_30, %c0_31], %48 {strides = array<i32>} : memref<128x1xf32, #tpu.memory_space<vmem>>, vector<128x1xf32>,
    } else {
    }
    %c0_i32_14 = arith.constant 0 : i32
    %27 = arith.cmpi eq, %arg1, %c0_i32_14 : i32
    %28 = arith.extui %27 : i1 to i32
    %c0_i32_15 = arith.constant 0 : i32
    %29 = arith.cmpi ne, %28, %c0_i32_15 : i32
    scf.if %29 {
      %c0_16 = arith.constant 0 : index
      %c0_17 = arith.constant 0 : index
      %30 = vector.load %arg7[%c0_16, %c0_17] : memref<128x1xf32, #tpu.memory_space<vmem>>, vector<128x1xf32>
      %c0_18 = arith.constant 0 : index
      %c0_19 = arith.constant 0 : index
      %31 = vector.load %arg8[%c0_18, %c0_19] : memref<128x1xf32, #tpu.memory_space<vmem>>, vector<128x1xf32>
      %32 = math.log %31 : vector<128x1xf32>
      %33 = arith.addf %30, %32 : vector<128x1xf32>
      %c0_20 = arith.constant 0 : index
      %c0_21 = arith.constant 0 : index
      %34 = vector.load %arg5[%c0_20, %c0_21] : memref<128x1xf32, #tpu.memory_space<vmem>>, vector<128x1xf32>
      tpu.vector_store %arg5[%c0_20, %c0_21], %33 {strides = array<i32>} : memref<128x1xf32, #tpu.memory_space<vmem>>, vector<128x1xf32>,
      %c0_22 = arith.constant 0 : index
      %c0_23 = arith.constant 0 : index
      %35 = vector.load %arg9[%c0_22, %c0_23] : memref<128x1xf32, #tpu.memory_space<vmem>>, vector<128x1xf32>
      %c0_24 = arith.constant 0 : index
      %c0_25 = arith.constant 0 : index
      %36 = vector.load %arg6[%c0_24, %c0_25] : memref<128x1xf32, #tpu.memory_space<vmem>>, vector<128x1xf32>
      tpu.vector_store %arg6[%c0_24, %c0_25], %35 {strides = array<i32>} : memref<128x1xf32, #tpu.memory_space<vmem>>, vector<128x1xf32>,
    } else {
    }
    return
  }
  func.func @transform_0(%arg0: i32, %arg1: i32) -> (i32, i32) {
    %c0_i32 = arith.constant 0 : i32
    %c0_i32_0 = arith.constant 0 : i32
    return %arg0, %c0_i32 : i32, i32
  }
  func.func @transform_1(%arg0: i32, %arg1: i32) -> (i32, i32) {
    %c0_i32 = arith.constant 0 : i32
    %c0_i32_0 = arith.constant 0 : i32
    %c0_i32_1 = arith.constant 0 : i32
    return %c0_i32, %c0_i32_0 : i32, i32
  }
  func.func @transform_2(%arg0: i32, %arg1: i32) -> (i32, i32) {
    %c0_i32 = arith.constant 0 : i32
    return %arg0, %arg1 : i32, i32
  }
  func.func @transform_3(%arg0: i32, %arg1: i32) -> (i32, i32) {
    %c0_i32 = arith.constant 0 : i32
    %c0_i32_0 = arith.constant 0 : i32
    return %arg0, %c0_i32 : i32, i32
  }
  func.func @transform_4(%arg0: i32, %arg1: i32) -> (i32, i32) {
    %c0_i32 = arith.constant 0 : i32
    %c0_i32_0 = arith.constant 0 : i32
    return %arg0, %c0_i32 : i32, i32
  }
}

</mosaic_0001>

<bundles_post_ra>
// kernel: contrastive_loss.1
= control target key start
LH: loop header
LB: loop body
LE: loop exit
PB: predicated region body
PF: predicated region fallthrough
CT: control target
= control target key end

     0   :  { %v1696_v40 = vmov 0   ;;  %vm2834_vm7 = vcmask 7168   ;;  %s2829_s1 = inlined_call_operand.vmem [shape: f32[128,128], index: 1, kind: input, shape index: {}]   ;;  %s2830_s0 = inlined_call_operand.vmem [shape: f32[128,128], index: 0, kind: input, shape index: {}]   ;;  %s2831_s2 = inlined_call_operand.vmem [shape: s8[128,128], index: 2, kind: input, shape index: {}]   ;;  %s2832_s4 = inlined_call_operand.vmem [shape: f32[128,1], index: 4, kind: output, shape index: {1}]   ;;  %s2833_s3 = inlined_call_operand.vmem [shape: f32[128,1], index: 3, kind: output, shape index: {0}]  }
   0x1   :  { %v89_v0 = vld [vmem:[%s2829_s1] sm:$0xff]  ;;  %v90_v1 = vld [vmem:[%s2829_s1 + $0x8] sm:$0xff]  ;;  %v91_v2 = vld [vmem:[%s2829_s1 + $0x10] sm:$0xff]  ;;  %1599 = vset.pattern.permute.xlu0 %v1696_v40  ;;  %1598 = vset.pattern.permute.xlu1 %v1696_v40 }
   0x2   :  { %v1547_v3 = vpack.c.bf16 %v90_v1, %v89_v0  ;;  %v92_v4 = vld [vmem:[%s2829_s1 + $0x18] sm:$0xff]  ;;  %v71_v6 = vld [vmem:[%s2830_s0] sm:$0xff]  ;;  %v94_v9 = vld [vmem:[%s2829_s1 + $0x28] sm:$0xff] }
   0x3   :  { %v1551_v5 = vpack.c.bf16 %v92_v4, %v91_v2  ;;  %v79_v7 = vld [vmem:[%s2830_s0 + $0x40] sm:$0xff]  ;;  %1523 = vmatprep.mubr.f32.mxu0 %v71_v6  ;;  %v95_v11 = vld [vmem:[%s2829_s1 + $0x30] sm:$0xff]  ;;  %v96_v12 = vld [vmem:[%s2829_s1 + $0x38] sm:$0xff] }
   0x4   :  { %1548 = vmatprep.subr.bf16.mxu0 %v1547_v3  ;;  %1579 = vmatprep.subr.bf16.mxu1 %v1547_v3  ;;  %v93_v8 = vld [vmem:[%s2829_s1 + $0x20] sm:$0xff]  ;;  %v1559_v13 = vpack.c.bf16 %v96_v12, %v95_v11  ;;  %v98_v15 = vld [vmem:[%s2829_s1 + $0x48] sm:$0xff]  ;;  %v99_v17 = vld [vmem:[%s2829_s1 + $0x50] sm:$0xff] }
   0x5   :  { %1550 = vmatpush3.bf16.xpose.msra.mxu0 %v1547_v3  ;;  %1587 = vmatpush3.bf16.xpose.msra.mxu1 %v1547_v3  ;;  %v1555_v10 = vpack.c.bf16 %v94_v9, %v93_v8  ;;  %v97_v14 = vld [vmem:[%s2829_s1 + $0x40] sm:$0xff]  ;;  %v100_v18 = vld [vmem:[%s2829_s1 + $0x58] sm:$0xff]  ;;  %v102_v21 = vld [vmem:[%s2829_s1 + $0x68] sm:$0xff] }
   0x6   :  { %1552 = vmatprep.subr.bf16.mxu0 %v1551_v5  ;;  %1580 = vmatprep.subr.bf16.mxu1 %v1551_v5  ;;  %v1563_v16 = vpack.c.bf16 %v98_v15, %v97_v14  ;;  %v1567_v19 = vpack.c.bf16 %v100_v18, %v99_v17  ;;  %v101_v20 = vld [vmem:[%s2829_s1 + $0x60] sm:$0xff]  ;;  %v103_v23 = vld [vmem:[%s2829_s1 + $0x70] sm:$0xff]  ;;  %v104_v24 = vld [vmem:[%s2829_s1 + $0x78] sm:$0xff]  ;;  %v476_v18 = vlaneseq }
   0x7   :  { %1535 = vmatprep.mubr.f32.mxu1 %v79_v7  ;;  %v1571_v22 = vpack.c.bf16 %v102_v21, %v101_v20  ;;  %v1575_v25 = vpack.c.bf16 %v104_v24, %v103_v23  ;;  %v72_v26 = vld [vmem:[%s2830_s0 + $0x8] sm:$0xff]  ;;  %v73_v28 = vld [vmem:[%s2830_s0 + $0x10] sm:$0xff]  ;;  %v74_v30 = vld [vmem:[%s2830_s0 + $0x18] sm:$0xff] }
   0x8   :  { %v80_v27 = vld [vmem:[%s2830_s0 + $0x48] sm:$0xff]  ;;  %v81_v29 = vld [vmem:[%s2830_s0 + $0x50] sm:$0xff]  ;;  %v82_v31 = vld [vmem:[%s2830_s0 + $0x58] sm:$0xff] }
   0x9   :  { %v75_v32 = vld [vmem:[%s2830_s0 + $0x20] sm:$0xff]  ;;  %v76_v34 = vld [vmem:[%s2830_s0 + $0x28] sm:$0xff]  ;;  %v77_v36 = vld [vmem:[%s2830_s0 + $0x30] sm:$0xff] }
   0xa   :  { %v83_v33 = vld [vmem:[%s2830_s0 + $0x60] sm:$0xff]  ;;  %v84_v35 = vld [vmem:[%s2830_s0 + $0x68] sm:$0xff]  ;;  %v85_v37 = vld [vmem:[%s2830_s0 + $0x70] sm:$0xff] }
   0xb   :  { %v78_v38 = vld [vmem:[%s2830_s0 + $0x38] sm:$0xff]  ;;  %v268_v41 = vld [vmem:[%s2831_s2 + $0x10] sm:$0xff]  ;;  %v266_v15 = vld [vmem:[%s2831_s2] sm:$0xff] }
   0xc   :  { %v86_v39 = vld [vmem:[%s2830_s0 + $0x78] sm:$0xff]  ;;  %vm272_vm0 = vnez %v268_v41  ;;  %vm270_vm11 = vnez %v266_v15  ;;  %v267_v20 = vld [vmem:[%s2831_s2 + $0x8] sm:$0xff] }
   0xd   :  { %1554 = vmatpush3.bf16.xpose.msra.mxu0 %v1551_v5  ;;  %1588 = vmatpush3.bf16.xpose.msra.mxu1 %v1551_v5  ;;  %v276_v42 = vsel %vm272_vm0, 16843009, %v1696_v40  ;;  %v269_v59 = vld [vmem:[%s2831_s2 + $0x18] sm:$0xff]  ;;  %v1697_v5 = vmov -inf   ;;  %vm271_vm12 = vnez %v267_v20 }
   0xe   :  { %1556 = vmatprep.subr.bf16.mxu0 %v1555_v10  ;;  %1581 = vmatprep.subr.bf16.mxu1 %v1555_v10  ;;  %v287_v43 = vunpack.c.1.s8 %v276_v42  ;;  %v286_v45 = vunpack.c.0.s8 %v276_v42  ;;  %v289_v48 = vunpack.c.3.s8 %v276_v42  ;;  %v288_v52 = vunpack.c.2.s8 %v276_v42  ;;  %32 = vst.msk [vmem:[#allocation2 + $0x48] sm:$0xff] %vm2834_vm7, %v1697_v5  ;;  %23 = vst.msk [vmem:[#allocation2] sm:$0xff] %vm2834_vm7, %v1697_v5 }
   0xf   :  { %vm273_vm5 = vnez %v269_v59  ;;  %24 = vst.msk [vmem:[#allocation2 + $0x8] sm:$0xff] %vm2834_vm7, %v1697_v5  ;;  %25 = vst.msk [vmem:[#allocation2 + $0x10] sm:$0xff] %vm2834_vm7, %v1697_v5 }
  0x10   :  { %v312_v44 = vpack.c.b16 %v287_v43, %v287_v43  ;;  %v310_v47 = vpack.c.b16 %v286_v45, %v286_v45  ;;  %v316_v51 = vpack.c.b16 %v289_v48, %v289_v48  ;;  %v314_v55 = vpack.c.b16 %v288_v52, %v288_v52  ;;  %26 = vst.msk [vmem:[#allocation2 + $0x18] sm:$0xff] %vm2834_vm7, %v1697_v5 }
  0x11   :  { %v277_v60 = vsel %vm273_vm5, 16843009, %v1696_v40  ;;  %27 = vst.msk [vmem:[#allocation2 + $0x20] sm:$0xff] %vm2834_vm7, %v1697_v5  ;;  %28 = vst.msk [vmem:[#allocation2 + $0x28] sm:$0xff] %vm2834_vm7, %v1697_v5 }
  0x12   :  { %v313_v46 = vpack.c.b8 %v312_v44, %v312_v44  ;;  %v311_v50 = vpack.c.b8 %v310_v47, %v310_v47  ;;  %v317_v53 = vpack.c.b8 %v316_v51, %v316_v51  ;;  %v315_v57 = vpack.c.b8 %v314_v55, %v314_v55  ;;  %29 = vst.msk [vmem:[#allocation2 + $0x30] sm:$0xff] %vm2834_vm7, %v1697_v5 }
  0x13   :  { %v291_v61 = vunpack.c.1.s8 %v277_v60  ;;  %v290_v62 = vunpack.c.0.s8 %v277_v60  ;;  %30 = vst.msk [vmem:[#allocation2 + $0x38] sm:$0xff] %vm2834_vm7, %v1697_v5  ;;  %31 = vst.msk [vmem:[#allocation2 + $0x40] sm:$0xff] %vm2834_vm7, %v1697_v5  ;;  %v293_v7 = vunpack.c.3.s8 %v277_v60  ;;  %v292_v8 = vunpack.c.2.s8 %v277_v60 }
  0x14   :  { %vm335_vm1 = vnez %v313_v46  ;;  %vm334_vm2 = vnez %v311_v50  ;;  %vm337_vm3 = vnez %v317_v53  ;;  %vm336_vm4 = vnez %v315_v57  ;;  %33 = vst.msk [vmem:[#allocation2 + $0x50] sm:$0xff] %vm2834_vm7, %v1697_v5  ;;  %34 = vst.msk [vmem:[#allocation2 + $0x58] sm:$0xff] %vm2834_vm7, %v1697_v5 }
  0x15   :  { %1558 = vmatpush3.bf16.xpose.msra.mxu0 %v1555_v10  ;;  %1589 = vmatpush3.bf16.xpose.msra.mxu1 %v1555_v10  ;;  %v1827_v49 = vsel %vm335_vm1, 16843009, %v1696_v40  ;;  %v1830_v54 = vsel %vm334_vm2, 16843009, %v1696_v40  ;;  %v1833_v56 = vsel %vm337_vm3, 16843009, %v1696_v40  ;;  %v320_v63 = vpack.c.b16 %v291_v61, %v291_v61 }
  0x16   :  { %1560 = vmatprep.subr.bf16.mxu0 %v1559_v13  ;;  %1582 = vmatprep.subr.bf16.mxu1 %v1559_v13  ;;  %v1836_v58 = vsel %vm336_vm4, 16843009, %v1696_v40  ;;  %v318_v0 = vpack.c.b16 %v290_v62, %v290_v62  ;;  %35 = vst.msk [vmem:[#allocation2 + $0x60] sm:$0xff] %vm2834_vm7, %v1697_v5  ;;  %36 = vst.msk [vmem:[#allocation2 + $0x68] sm:$0xff] %vm2834_vm7, %v1697_v5  ;;  %v324_v9 = vpack.c.b16 %v293_v7, %v293_v7 }
  0x17   :  { %v321_v1 = vpack.c.b8 %v320_v63, %v320_v63  ;;  %37 = vst.msk [vmem:[#allocation2 + $0x70] sm:$0xff] %vm2834_vm7, %v1697_v5  ;;  %38 = vst.msk [vmem:[#allocation2 + $0x78] sm:$0xff] %vm2834_vm7, %v1697_v5  ;;  %v322_v10 = vpack.c.b16 %v292_v8, %v292_v8  ;;  %v367_v15 = vunpack.c.0.s8 %v1827_v49  ;;  %v366_v49 = vunpack.c.0.s8 %v1830_v54 }
  0x18   :  { %v319_v2 = vpack.c.b8 %v318_v0, %v318_v0  ;;  %v325_v11 = vpack.c.b8 %v324_v9, %v324_v9 }
  0x19   :  { %vm339_vm6 = vnez %v321_v1  ;;  %v323_v12 = vpack.c.b8 %v322_v10, %v322_v10 }
  0x1a   :  { %v1843_v3 = vsel %vm339_vm6, 16843009, %v1696_v40  ;;  %vm1845_vm8 = vnez %v319_v2  ;;  %vm341_vm9 = vnez %v325_v11 }
  0x1b   :  { %v1868_v6 = vsel %vm1845_vm8, 16843009, %v1696_v40  ;;  %vm340_vm10 = vnez %v323_v12 }
  0x1c   :  { %v1874_v14 = vsel %vm340_vm10, 16843009, %v1696_v40  ;;  %v370_v1 = vunpack.c.0.s8 %v1868_v6  ;;  %v2923_v6 = vmov 0 }
  0x1d   :  { %1562 = vmatpush3.bf16.xpose.msra.mxu0 %v1559_v13  ;;  %1590 = vmatpush3.bf16.xpose.msra.mxu1 %v1559_v13  ;;  %v1871_v13 = vsel %vm341_vm9, 16843009, %v1696_v40 }
  0x1e   :  { %1564 = vmatprep.subr.bf16.mxu0 %v1563_v16  ;;  %1583 = vmatprep.subr.bf16.mxu1 %v1563_v16 }
  0x25   :  { %1566 = vmatpush3.bf16.xpose.msra.mxu0 %v1563_v16  ;;  %1591 = vmatpush3.bf16.xpose.msra.mxu1 %v1563_v16  ;;  %v274_v16 = vsel %vm270_vm11, 16843009, %v1696_v40 }
  0x26   :  { %1568 = vmatprep.subr.bf16.mxu0 %v1567_v19  ;;  %1584 = vmatprep.subr.bf16.mxu1 %v1567_v19  ;;  %v278_v17 = vunpack.c.0.s8 %v274_v16  ;;  %v280_v23 = vunpack.c.2.s8 %v274_v16 }
  0x28   :  { %v294_v21 = vpack.c.b16 %v278_v17, %v278_v17 }
  0x2d   :  { %1570 = vmatpush3.bf16.xpose.msra.mxu0 %v1567_v19  ;;  %1592 = vmatpush3.bf16.xpose.msra.mxu1 %v1567_v19  ;;  %v279_v19 = vunpack.c.1.s8 %v274_v16 }
  0x2e   :  { %1572 = vmatprep.subr.bf16.mxu0 %v1571_v22  ;;  %1585 = vmatprep.subr.bf16.mxu1 %v1571_v22 }
  0x2f   :  { %v296_v24 = vpack.c.b16 %v279_v19, %v279_v19 }
  0x35   :  { %1574 = vmatpush3.bf16.xpose.msra.mxu0 %v1571_v22  ;;  %1593 = vmatpush3.bf16.xpose.msra.mxu1 %v1571_v22  ;;  %v1883_v22 = vshrl.u32 %v476_v18, 7 }
  0x36   :  { %1576 = vmatprep.subr.bf16.mxu0 %v1575_v25  ;;  %1586 = vmatprep.subr.bf16.mxu1 %v1575_v25 }
  0x37   :  { %v485_v50 = vadd.s32 64, %v1883_v22  ;;  %v488_v52 = vadd.s32 88, %v1883_v22  ;;  %v487_v59 = vadd.s32 80, %v1883_v22  ;;  %v479_v4 = vadd.s32 16, %v1883_v22 }
  0x38   :  { %v1933_v17 = vadd.s32 32, %v1883_v22  ;;  %v489_v57 = vadd.s32 96, %v1883_v22 }
  0x3d   :  { %1578 = vmatpush3.bf16.xpose.msra.mxu0 %v1575_v25  ;;  %1594 = vmatpush3.bf16.xpose.msra.mxu1 %v1575_v25  ;;  %v281_v25 = vunpack.c.3.s8 %v274_v16  ;;  %v1930_v16 = vadd.s32 40, %v1883_v22 }
  0x44   :  { %1524 = vmatmul.mubr.f32.vlgmr.msra.gmra.mrb[0].mxu0 %v72_v26  ;;  %1536 = vmatmul.mubr.f32.vlgmr.msra.gmra.mrb[0].mxu1 %v80_v27  ;;  %v295_v26 = vpack.c.b8 %v294_v21, %v294_v21  ;;  %v486_v27 = vadd.s32 72, %v1883_v22 }
  0x45   :  { %1526 = vmatprep.mubr.f32.mxu0 %v73_v28  ;;  %1538 = vmatprep.mubr.f32.mxu1 %v81_v29  ;;  %v1886_v28 = vand.u32 127, %v476_v18  ;;  %v275_v29 = vsel %vm271_vm12, 16843009, %v1696_v40 }
  0x46   :  { %vm326_vm13 = vnez %v295_v26  ;;  %v284_v53 = vunpack.c.2.s8 %v275_v29  ;;  %v285_v55 = vunpack.c.3.s8 %v275_v29 }
  0x47   :  { %v495_v45 = vsub.s32 %v1883_v22, %v1886_v28  ;;  %vm2835_vm2 = vcmp.ge.s32.totalorder %v1886_v28, 8  ;;  %v503_v2 = vsub.s32 %v485_v50, %v1886_v28  ;;  %v506_v7 = vsub.s32 %v488_v52, %v1886_v28 }
  0x48   :  { %1527 = vmatmul.mubr.f32.gmra.mrb[2].mxu0 %v74_v30  ;;  %1539 = vmatmul.mubr.f32.gmra.mrb[2].mxu1 %v82_v31  ;;  %v298_v30 = vpack.c.b16 %v280_v23, %v280_v23  ;;  %v297_v31 = vpack.c.b8 %v296_v24, %v296_v24  ;;  %v306_v9 = vpack.c.b16 %v284_v53, %v284_v53  ;;  %v565_v53 = vld [vmem:[#allocation2] sm:$0xff] }
  0x49   :  { %1529 = vmatprep.mubr.f32.mxu0 %v75_v32  ;;  %1541 = vmatprep.mubr.f32.mxu1 %v83_v33  ;;  %v300_v32 = vpack.c.b16 %v281_v25, %v281_v25  ;;  %v478_v33 = vadd.s32 8, %v1883_v22  ;;  %vm1910_vm4 = vcmp.eq.s32.totalorder %v495_v45, 0  ;;  %v308_v10 = vpack.c.b16 %v285_v55, %v285_v55 }
  0x4a   :  { %vm327_vm14 = vnez %v297_v31  ;;  %v505_v11 = vsub.s32 %v487_v59, %v1886_v28  ;;  %vm1935_vm10 = vcmp.eq.s32.totalorder %v503_v2, 0  ;;  %v497_v20 = vsub.s32 %v479_v4, %v1886_v28 }
  0x4b   :  { %v301_v41 = vpack.c.b8 %v300_v32, %v300_v32  ;;  %v496_v42 = vsub.s32 %v478_v33, %v1886_v28  ;;  %v343_v46 = vsel %vm327_vm14, 16843009, %v1696_v40  ;;  %vm1945_vm12 = vcmp.eq.s32.totalorder %v506_v7, 0 }
  0x4c   :  { %1530 = vmatmul.mubr.f32.gmra.mrb[4].mxu0 %v76_v34  ;;  %1542 = vmatmul.mubr.f32.gmra.mrb[4].mxu1 %v84_v35  ;;  %v282_v34 = vunpack.c.0.s8 %v275_v29  ;;  %v504_v35 = vsub.s32 %v486_v27, %v1886_v28  ;;  %v359_v63 = vunpack.c.0.s8 %v343_v46  ;;  %v307_v25 = vpack.c.b8 %v306_v9, %v306_v9 }
  0x4d   :  { %1532 = vmatprep.mubr.f32.mxu0 %v77_v36  ;;  %1544 = vmatprep.mubr.f32.mxu1 %v85_v37  ;;  %v283_v36 = vunpack.c.1.s8 %v275_v29  ;;  %v480_v37 = vadd.s32 24, %v1883_v22  ;;  %vm329_vm1 = vnez %v301_v41  ;;  %vm1905_vm3 = vcmp.eq.s32.totalorder %v496_v42, 0 }
  0x4e   :  { %v302_v43 = vpack.c.b16 %v282_v34, %v282_v34  ;;  %vm1894_vm15 = vcmp.eq.s32.totalorder %v504_v35, 0  ;;  %v345_v5 = vsel %vm329_vm1, 16843009, %v1696_v40  ;;  %vm1940_vm11 = vcmp.ne.s32.totalorder %v359_v63, 0 }
  0x4f   :  { %v304_v47 = vpack.c.b16 %v283_v36, %v283_v36  ;;  %v498_v48 = vsub.s32 %v480_v37, %v1886_v28  ;;  %v361_v18 = vunpack.c.0.s8 %v345_v5  ;;  %v309_v26 = vpack.c.b8 %v308_v10, %v308_v10 }
  0x50   :  { %1533 = vmatmul.mubr.f32.gmra.mrb[6].mxu0 %v78_v38  ;;  %1545 = vmatmul.mubr.f32.gmra.mrb[6].mxu1 %v86_v39  ;;  %v299_v38 = vpack.c.b8 %v298_v30, %v298_v30  ;;  %v342_v39 = vsel %vm326_vm13, 16843009, %v1696_v40  ;;  %v303_v60 = vpack.c.b8 %v302_v43, %v302_v43  ;;  %vm1954_vm13 = vmor %vm1894_vm15, %vm2835_vm2  ;;  %vm1958_vm14 = vcmp.eq.s32.totalorder %v505_v11, 0 }
  0x51   :  { %v358_v51 = vunpack.c.0.s8 %v342_v39  ;;  %v305_v0 = vpack.c.b8 %v304_v47, %v304_v47  ;;  %vm1915_vm5 = vcmp.eq.s32.totalorder %v498_v48, 0  ;;  %v2889_v29 = vmov 0  ;;  %vm1975_vm15 = vmor %vm1905_vm3, %vm2835_vm2 }
  0x52   :  { %vm328_vm0 = vnez %v299_v38  ;;  %vm330_vm8 = vnez %v303_v60  ;;  %v2890_v29 = vsel %vm1958_vm14, 4294967295, %v2889_v29  ;;  %vm1967_vm1 = vcmp.ne.s32.totalorder %v367_v15, 0 }
  0x53   :  { %v344_v62 = vsel %vm328_vm0, 16843009, %v1696_v40  ;;  %vm1923_vm6 = vcmp.ne.s32.totalorder %v358_v51, 0  ;;  %vm331_vm9 = vnez %v305_v0  ;;  %v346_v24 = vsel %vm330_vm8, 16843009, %v1696_v40 }
  0x54   :  { %v360_v12 = vunpack.c.0.s8 %v344_v62  ;;  %v347_v30 = vsel %vm331_vm9, 16843009, %v1696_v40  ;;  %v2893_v31 = vmov 0  ;;  %v500_v33 = vsub.s32 %v1930_v16, %v1886_v28 }
  0x55   :  { %v2894_v31 = vsel %vm1967_vm1, 4294967295, %v2893_v31  ;;  %v499_v34 = vsub.s32 %v1933_v17, %v1886_v28  ;;  %vm1983_vm8 = vcmp.ne.s32.totalorder %v361_v18, 0  ;;  %v2897_v35 = vmov 0 }
  0x56   :  { %vm1962_vm0 = vcmp.ne.s32.totalorder %v360_v12, 0  ;;  %v2898_v35 = vsel %vm1983_vm8, 4294967295, %v2897_v35  ;;  %v369_v36 = vunpack.c.0.s8 %v1833_v56  ;;  %vm1988_vm9 = vcmp.eq.s32.totalorder %v497_v20, 0 }
  0x57   :  { %v2899_v37 = vmov 0  ;;  %v1993_v38 = vadd.s32 104, %v1883_v22  ;;  %v362_v39 = vunpack.c.0.s8 %v346_v24  ;;  %vm1995_vm3 = vcmp.ne.s32.totalorder %v366_v49, 0  ;;  %v576_v49 = vld [vmem:[#allocation2 + $0x58] sm:$0xff] }
  0x58   :  { %v2900_v37 = vsel %vm1988_vm9, 4294967295, %v2899_v37  ;;  %v2901_v41 = vmov 0  ;;  %v368_v42 = vunpack.c.0.s8 %v1836_v58  ;;  %vm2004_vm7 = vnez %v307_v25 }
  0x59   :  { %v2902_v41 = vsel %vm1995_vm3, 4294967295, %v2901_v41  ;;  %v363_v45 = vunpack.c.0.s8 %v347_v30  ;;  %vm2008_vm2 = vnez %v309_v26  ;;  %v371_v47 = vunpack.c.0.s8 %v1843_v3 }
  0x5a   :  { %vm2908_vm9 = vcmp.ge.s32.totalorder %v1886_v28, 8  ;;  %v2914_v60 = vmov 0  ;;  %v349_v63 = vsel %vm2008_vm2, 16843009, %v1696_v40  ;;  %v2918_v0 = vmov 0 }
  0x5b   :  { %vm2031_vm14 = vmor %vm1910_vm4, %vm2908_vm9  ;;  %v508_v7 = vsub.s32 %v1993_v38, %v1886_v28  ;;  %v348_v9 = vsel %vm2004_vm7, 16843009, %v1696_v40  ;;  %vm2091_vm2 = vcmp.ne.s32.totalorder %v363_v45, 0  ;;  %vm2095_vm1 = vcmp.ne.s32.totalorder %v371_v47, 0 }
  0x5c   :  { %v2924_v6 = vsel %vm2091_vm2, 4294967295, %v2923_v6  ;;  %v2925_v10 = vmov 0  ;;  %v365_v23 = vunpack.c.0.s8 %v349_v63  ;;  %v373_v25 = vunpack.c.0.s8 %v1871_v13 }
  0x5d   :  { %v2926_v10 = vsel %vm2095_vm1, 4294967295, %v2925_v10  ;;  %v364_v19 = vunpack.c.0.s8 %v348_v9  ;;  %v2932_v27 = vmov 0  ;;  %v372_v30 = vunpack.c.0.s8 %v1874_v14 }
  0x5e   :  { %2927 = vst [vmem:[#allocation7_spill] sm:$0xff] %v2926_v10  ;;  %v484_v14 = vadd.s32 56, %v1883_v22  ;;  %v2949_v3 = vmov 0  ;;  %vm2204_vm1 = vcmp.ne.s32.totalorder %v373_v25, 0  ;;  %v2951_v55 = vmov 0  ;;  %v571_v10 = vld [vmem:[#allocation2 + $0x30] sm:$0xff] }
  0x5f   :  { %v2952_v55 = vsel %vm2204_vm1, 4294967295, %v2951_v55  ;;  %vm2228_vm2 = vcmp.ne.s32.totalorder %v364_v19, 0  ;;  %v2960_v9 = vmov 0  ;;  %v492_v32 = vadd.s32 120, %v1883_v22 }
  0x60   :  { %2953 = vst [vmem:[#allocation12_spill] sm:$0xff] %v2952_v55  ;;  %v502_v25 = vsub.s32 %v484_v14, %v1886_v28  ;;  %v568_v14 = vld [vmem:[#allocation2 + $0x18] sm:$0xff] }
  0x61   :  { %v510_v63 = vsub.s32 %v492_v32, %v1886_v28  ;;  %v1698_v32 = vmov 0.0  }
  0x62   :  { %vm521_vm1 = vcmp.eq.s32.totalorder %v502_v25, 0 }
 0x117   :  { %v2000_v43 = vpop.f32.mrb[0].mxu0  ;;  %v2002_v44 = vpop.f32.mrb[0].mxu1 }
 0x118   :  { %v2013_v48 = vpop.f32.mrb[1].mxu0  ;;  %v2018_v58 = vsel %vm1954_vm13, -inf, %v2002_v44  ;;  %v2023_v50 = vsel %vm1975_vm15, -inf, %v2000_v43  ;;  %v2025_v51 = vpop.f32.mrb[1].mxu1  ;;  %vm2911_vm13 = vmmov %vm2908_vm9  ;;  %vm2055_vm15 = vcmp.ne.s32.totalorder %v369_v36, 0  ;;  %vm2062_vm9 = vcmp.ne.s32.totalorder %v362_v39, 0 }
 0x119   :  { %2907 = vst [vmem:[#allocation5_spill] sm:$0xff] %v2025_v51  ;;  %599 = vmax.xlane.f32.xlu1 %v2018_v58  ;;  %583 = vmax.xlane.f32.xlu0 %v2023_v50  ;;  %vm2047_vm4 = vmor %vm1915_vm5, %vm2911_vm13  ;;  %v2915_v60 = vsel %vm2055_vm15, 4294967295, %v2914_v60  ;;  %vm2069_vm5 = vcmp.ne.s32.totalorder %v368_v42, 0  ;;  %v2102_v11 = vsel %vm2031_vm14, -inf, %v2013_v48  ;;  %v507_v39 = vsub.s32 %v489_v57, %v1886_v28 }
 0x11a   :  { %v2919_v0 = vsel %vm2069_vm5, 4294967295, %v2918_v0  ;;  %vm2082_vm3 = vmor %vm1945_vm12, %vm2911_vm13  ;;  %v483_v42 = vadd.s32 48, %v1883_v22  ;;  %vm2200_vm5 = vcmp.ne.s32.totalorder %v365_v23, 0  ;;  %vm2224_vm15 = vcmp.eq.s32.totalorder %v508_v7, 0 }
 0x11b   :  { %2920 = vst [vmem:[#allocation6_spill] sm:$0xff] %v2919_v0  ;;  %v2074_v2 = vpop.f32.mrb[2].mxu0  ;;  %v2076_v4 = vpop.f32.mrb[2].mxu1  ;;  %vm2929_vm7 = vmmov %vm2911_vm13  ;;  %v2950_v3 = vsel %vm2200_vm5, 4294967295, %v2949_v3  ;;  %v3034_v8 = vsel %vm1940_vm11, %v2000_v43, 0.0  ;;  %vm3041_vm11 = vnez %v2894_v31 }
 0x11c   :  { %v2107_v12 = vsel %vm2047_vm4, -inf, %v2074_v2  ;;  %v2109_v15 = vpop.f32.mrb[3].mxu0  ;;  %v2111_v40 = vpop.f32.mrb[3].mxu1  ;;  %vm2125_vm12 = vmor %vm1935_vm10, %vm2929_vm7  ;;  %v2139_v26 = vsel %vm2082_vm3, -inf, %v2076_v4  ;;  %vm2141_vm10 = vcmp.ne.s32.totalorder %v370_v1, 0  ;;  %vm2936_vm4 = vnez %v2890_v29 }
 0x11d   :  { %2928 = vst [vmem:[#allocation8_spill] sm:$0xff] %v2111_v40  ;;  %581 = vmax.xlane.f32.xlu0 %v2102_v11  ;;  %587 = vmax.xlane.f32.xlu1 %v2107_v12  ;;  %v2933_v27 = vsel %vm2141_vm10, 4294967295, %v2932_v27  ;;  %vm2935_vm14 = vmmov %vm2929_vm7  ;;  %vm2156_vm7 = vcmp.eq.s32.totalorder %v500_v33, 0  ;;  %v2168_v29 = vsel %vm2125_vm12, -inf, %v2025_v51  ;;  %vm2175_vm3 = vcmp.eq.s32.totalorder %v499_v34, 0 }
 0x11e   :  { %2934 = vst [vmem:[#allocation9_spill] sm:$0xff] %v2933_v27  ;;  %vm2150_vm13 = vmor %vm2936_vm4, %vm2935_vm14  ;;  %vm2232_vm10 = vcmp.ne.s32.totalorder %v372_v30, 0  ;;  %v501_v19 = vsub.s32 %v483_v42, %v1886_v28  ;;  %v569_v27 = vld [vmem:[#allocation2 + $0x20] sm:$0xff] }
 0x11f   :  { %v2154_v13 = vpop.f32.mrb[4].mxu0  ;;  %v2160_v38 = vpop.f32.mrb[4].mxu1  ;;  %vm2945_vm12 = vmmov %vm2935_vm14  ;;  %vm2946_vm14 = vnez %v2900_v37  ;;  %v2214_v57 = vsel %vm2150_vm13, -inf, %v2111_v40  ;;  %v2961_v9 = vsel %vm2232_vm10, 4294967295, %v2960_v9  ;;  %v491_v37 = vadd.s32 112, %v1883_v22  ;;  %v578_v40 = vld [vmem:[#allocation2 + $0x68] sm:$0xff] }
 0x120   :  { %2941 = vst [vmem:[#allocation10_spill] sm:$0xff] %v2160_v38  ;;  %v2170_v56 = vpop.f32.mrb[5].mxu0  ;;  %v2179_v45 = vpop.f32.mrb[5].mxu1  ;;  %vm2193_vm4 = vmor %vm2946_vm14, %vm2945_vm12 }
 0x121   :  { %2944 = vst [vmem:[#allocation11_spill] sm:$0xff] %v2179_v45  ;;  %597 = vmax.xlane.f32.xlu0 %v2168_v29  ;;  %603 = vmax.xlane.f32.xlu1 %v2139_v26  ;;  %vm2220_vm14 = vmor %vm2156_vm7, %vm2945_vm12  ;;  %v2258_v36 = vsel %vm2193_vm4, -inf, %v2109_v15  ;;  %v509_v22 = vsub.s32 %v491_v37, %v1886_v28  ;;  %v574_v28 = vld [vmem:[#allocation2 + $0x48] sm:$0xff] }
 0x122   :  { %2962 = vst [vmem:[#allocation13_spill] sm:$0xff] %v2961_v9  ;;  %vm2963_vm13 = vmmov %vm2945_vm12  ;;  %vm2244_vm12 = vcmp.eq.s32.totalorder %v507_v39, 0  ;;  %v2282_v24 = vsel %vm2220_vm14, -inf, %v2154_v13  ;;  %vm520_vm14 = vcmp.eq.s32.totalorder %v501_v19, 0  ;;  %v567_v9 = vld [vmem:[#allocation2 + $0x10] sm:$0xff]  ;;  %v3052_v31 = vld [vmem:[#allocation6_spill] sm:$0xff] }
 0x123   :  { %vm2240_vm7 = vmor %vm2175_vm3, %vm2963_vm13  ;;  %v2248_v23 = vpop.f32.mrb[6].mxu0  ;;  %v2252_v30 = vpop.f32.mrb[6].mxu1  ;;  %vm528_vm5 = vcmp.eq.s32.totalorder %v509_v22, 0  ;;  %v566_v22 = vld [vmem:[#allocation2 + $0x8] sm:$0xff] }
 0x124   :  { %2968 = vst [vmem:[#allocation14_spill] sm:$0xff] %v2252_v30  ;;  %v2260_v33 = vpop.f32.mrb[7].mxu0  ;;  %v2262_v39 = vpop.f32.mrb[7].mxu1  ;;  %v2287_v42 = vsel %vm2240_vm7, -inf, %v2170_v56  ;;  %vm2970_vm3 = vmmov %vm2963_vm13 }
 0x125   :  { %2969 = vst [vmem:[#allocation15_spill] sm:$0xff] %v2262_v39  ;;  %601 = vmax.xlane.f32.xlu0 %v2214_v57  ;;  %585 = vmax.xlane.f32.xlu1 %v2258_v36  ;;  %vm546_vm4 = vmor %vm2224_vm15, %vm2970_vm3 }
 0x126   :  { %vm2971_vm13 = vmmov %vm2970_vm3  ;;  %v2302_v20 = vsel %vm546_vm4, -inf, %v2160_v38  ;;  %v572_v38 = vld [vmem:[#allocation2 + $0x38] sm:$0xff] }
 0x127   :  { %vm545_vm10 = vmor %vm2244_vm12, %vm2971_vm13  ;;  %vm529_vm13 = vcmp.eq.s32.totalorder %v510_v63, 0 }
 0x128   :  { %v2305_v1 = vsel %vm545_vm10, -inf, %v2179_v45  ;;  %vm2972_vm15 = vmmov %vm2970_vm3 }
 0x129   :  { %591 = vmax.xlane.f32.xlu1 %v2282_v24  ;;  %589 = vmax.xlane.f32.xlu0 %v2287_v42  ;;  %vm540_vm7 = vmor %vm521_vm1, %vm2972_vm15 }
 0x12a   :  { %vm2973_vm12 = vmmov %vm2970_vm3  ;;  %v2314_v37 = vsel %vm540_vm7, -inf, %v2248_v23 }
 0x12b   :  { %vm539_vm3 = vmor %vm520_vm14, %vm2973_vm12  ;;  %vm2976_vm14 = vcmask 7168  }
 0x12c   :  { %v2317_v7 = vsel %vm539_vm3, -inf, %v2260_v33  ;;  %vm2974_vm10 = vmmov %vm2973_vm12  ;;  %55 = vst.msk [vmem:[#allocation4] sm:$0xff] %vm2976_vm14, %v1698_v32 }
 0x12d   :  { %607 = vmax.xlane.f32.xlu1 %v2302_v20  ;;  %605 = vmax.xlane.f32.xlu0 %v2305_v1  ;;  %vm548_vm4 = vmor %vm529_vm13, %vm2974_vm10 }
 0x12e   :  { %vm2975_vm1 = vmmov %vm2974_vm10  ;;  %v2326_v25 = vsel %vm548_vm4, -inf, %v2252_v30 }
 0x12f   :  { %vm547_vm15 = vmor %vm528_vm5, %vm2975_vm1 }
 0x130   :  { %v2329_v19 = vsel %vm547_vm15, -inf, %v2262_v39  ;;  %vm2977_vm7 = vmmov %vm2976_vm14 }
 0x131   :  { %595 = vmax.xlane.f32.xlu1 %v2314_v37  ;;  %593 = vmax.xlane.f32.xlu0 %v2317_v7  ;;  %39 = vst.msk [vmem:[#allocation3] sm:$0xff] %vm2977_vm7, %v1698_v32  ;;  %vm2978_vm12 = vmmov %vm2977_vm7 }
 0x132   :  { %40 = vst.msk [vmem:[#allocation3 + $0x8] sm:$0xff] %vm2978_vm12, %v1698_v32  ;;  %vm2979_vm3 = vmmov %vm2977_vm7 }
 0x133   :  { %41 = vst.msk [vmem:[#allocation3 + $0x10] sm:$0xff] %vm2979_vm3, %v1698_v32  ;;  %vm2980_vm5 = vmmov %vm2979_vm3 }
 0x134   :  { %42 = vst.msk [vmem:[#allocation3 + $0x18] sm:$0xff] %vm2980_vm5, %v1698_v32  ;;  %vm2981_vm13 = vmmov %vm2979_vm3 }
 0x135   :  { %43 = vst.msk [vmem:[#allocation3 + $0x20] sm:$0xff] %vm2981_vm13, %v1698_v32  ;;  %vm2982_vm10 = vmmov %vm2979_vm3  ;;  %611 = vmax.xlane.f32.xlu1 %v2326_v25  ;;  %609 = vmax.xlane.f32.xlu0 %v2329_v19 }
 0x136   :  { %44 = vst.msk [vmem:[#allocation3 + $0x28] sm:$0xff] %vm2982_vm10, %v1698_v32  ;;  %vm2983_vm4 = vmmov %vm2979_vm3 }
 0x137   :  { %45 = vst.msk [vmem:[#allocation3 + $0x30] sm:$0xff] %vm2983_vm4, %v1698_v32  ;;  %vm2984_vm1 = vmmov %vm2979_vm3 }
 0x138   :  { %46 = vst.msk [vmem:[#allocation3 + $0x38] sm:$0xff] %vm2984_vm1, %v1698_v32  ;;  %vm2985_vm15 = vmmov %vm2984_vm1 }
 0x139   :  { %47 = vst.msk [vmem:[#allocation3 + $0x40] sm:$0xff] %vm2985_vm15, %v1698_v32  ;;  %vm2986_vm8 = vmmov %vm2984_vm1 }
 0x13a   :  { %48 = vst.msk [vmem:[#allocation3 + $0x48] sm:$0xff] %vm2986_vm8, %v1698_v32  ;;  %vm2987_vm14 = vmmov %vm2984_vm1 }
 0x13b   :  { %49 = vst.msk [vmem:[#allocation3 + $0x50] sm:$0xff] %vm2987_vm14, %v1698_v32  ;;  %vm2988_vm7 = vmmov %vm2984_vm1 }
 0x13c   :  { %50 = vst.msk [vmem:[#allocation3 + $0x58] sm:$0xff] %vm2988_vm7, %v1698_v32  ;;  %vm2989_vm12 = vmmov %vm2984_vm1 }
 0x13d   :  { %51 = vst.msk [vmem:[#allocation3 + $0x60] sm:$0xff] %vm2989_vm12, %v1698_v32  ;;  %vm2990_vm3 = vmmov %vm2984_vm1 }
 0x13e   :  { %52 = vst.msk [vmem:[#allocation3 + $0x68] sm:$0xff] %vm2990_vm3, %v1698_v32  ;;  %vm2991_vm5 = vmmov %vm2984_vm1 }
 0x13f   :  { %53 = vst.msk [vmem:[#allocation3 + $0x70] sm:$0xff] %vm2991_vm5, %v1698_v32  ;;  %vm2992_vm13 = vmmov %vm2984_vm1 }
 0x140   :  { %54 = vst.msk [vmem:[#allocation3 + $0x78] sm:$0xff] %vm2992_vm13, %v1698_v32  ;;  %vm2993_vm10 = vmmov %vm2984_vm1 }
 0x141   :  { %56 = vst.msk [vmem:[#allocation4 + $0x8] sm:$0xff] %vm2993_vm10, %v1698_v32  ;;  %vm2994_vm4 = vmmov %vm2984_vm1 }
 0x142   :  { %57 = vst.msk [vmem:[#allocation4 + $0x10] sm:$0xff] %vm2994_vm4, %v1698_v32  ;;  %vm2995_vm15 = vmmov %vm2984_vm1 }
 0x143   :  { %58 = vst.msk [vmem:[#allocation4 + $0x18] sm:$0xff] %vm2984_vm1, %v1698_v32  ;;  %vm2996_vm8 = vmmov %vm2984_vm1 }
 0x144   :  { %59 = vst.msk [vmem:[#allocation4 + $0x20] sm:$0xff] %vm2995_vm15, %v1698_v32  ;;  %vm2997_vm14 = vmmov %vm2984_vm1 }
 0x145   :  { %60 = vst.msk [vmem:[#allocation4 + $0x28] sm:$0xff] %vm2996_vm8, %v1698_v32  ;;  %vm2998_vm7 = vmmov %vm2984_vm1 }
 0x146   :  { %61 = vst.msk [vmem:[#allocation4 + $0x30] sm:$0xff] %vm2997_vm14, %v1698_v32  ;;  %vm2999_vm12 = vmmov %vm2984_vm1 }
 0x147   :  { %62 = vst.msk [vmem:[#allocation4 + $0x38] sm:$0xff] %vm2998_vm7, %v1698_v32  ;;  %vm3000_vm3 = vmmov %vm2984_vm1 }
 0x148   :  { %63 = vst.msk [vmem:[#allocation4 + $0x40] sm:$0xff] %vm2999_vm12, %v1698_v32  ;;  %vm3001_vm5 = vmmov %vm2984_vm1 }
 0x149   :  { %64 = vst.msk [vmem:[#allocation4 + $0x48] sm:$0xff] %vm3000_vm3, %v1698_v32  ;;  %vm3002_vm13 = vmmov %vm2984_vm1 }
 0x14a   :  { %65 = vst.msk [vmem:[#allocation4 + $0x50] sm:$0xff] %vm3001_vm5, %v1698_v32  ;;  %vm3003_vm10 = vmmov %vm2984_vm1 }
 0x14b   :  { %66 = vst.msk [vmem:[#allocation4 + $0x58] sm:$0xff] %vm3002_vm13, %v1698_v32  ;;  %vm3004_vm4 = vmmov %vm2984_vm1 }
 0x14c   :  { %67 = vst.msk [vmem:[#allocation4 + $0x60] sm:$0xff] %vm3003_vm10, %v1698_v32  ;;  %vm3005_vm15 = vmmov %vm2984_vm1 }
 0x14d   :  { %68 = vst.msk [vmem:[#allocation4 + $0x68] sm:$0xff] %vm3004_vm4, %v1698_v32  ;;  %vm3008_vm8 = vmmov %vm2984_vm1 }
 0x14e   :  { %69 = vst.msk [vmem:[#allocation4 + $0x70] sm:$0xff] %vm2984_vm1, %v1698_v32  ;;  %vm3009_vm14 = vmmov %vm2984_vm1 }
 0x14f   :  { %70 = vst.msk [vmem:[#allocation4 + $0x78] sm:$0xff] %vm3005_vm15, %v1698_v32  ;;  %vm3012_vm7 = vmmov %vm2984_vm1 }
 0x150   :  { %vm3013_vm12 = vmmov %vm2984_vm1 }
 0x151   :  { %vm3014_vm3 = vmmov %vm2984_vm1 }
 0x152   :  { %vm3015_vm5 = vmmov %vm2984_vm1 }
 0x153   :  { %vm3016_vm13 = vmmov %vm2984_vm1 }
 0x154   :  { %vm3017_vm10 = vmmov %vm2984_vm1 }
 0x155   :  { %vm3019_vm15 = vmmov %vm2984_vm1 }
 0x1a6   :  { %v600_v63 = vpop.xlane.xlu1 %599  ;;  %v584_v47 = vpop.xlane.xlu0 %583 }
 0x1a7   :  { %v2365_v61 = vmax.f32 %v574_v28, %v600_v63  ;;  %v2367_v18 = vmax.f32 %v566_v22, %v584_v47 }
 0x1a9   :  { %3006 = vst [vmem:[#allocation16_spill] sm:$0xff] %v2365_v61  ;;  %3007 = vst [vmem:[#allocation17_spill] sm:$0xff] %v2367_v18  ;;  %v654_v46 = vsub.f32 %v574_v28, %v2365_v61  ;;  %v646_v32 = vsub.f32 %v566_v22, %v2367_v18  ;;  %716 = vperm.xlu1 %1598, %v2367_v18   ;;  %756 = vperm.xlu0 %1599, %v2365_v61   ;;  %v573_v28 = vld [vmem:[#allocation2 + $0x40] sm:$0xff]  ;;  %vm638_vm4 = vcmp.gt.f32.partialorder %v2365_v61, -inf }
 0x1aa   :  { %958 = vst.msk [vmem:[#allocation2 + $0x48] sm:$0xff] %vm3008_vm8, %v2365_v61  ;;  %v582_v63 = vpop.xlane.xlu0 %581  ;;  %v588_v16 = vpop.xlane.xlu1 %587  ;;  %vm630_vm8 = vcmp.gt.f32.partialorder %v2367_v18, -inf }
 0x1ab   :  { %950 = vst.msk [vmem:[#allocation2 + $0x8] sm:$0xff] %vm3009_vm14, %v2367_v18  ;;  %v679_v47 = vmul.f32 1.442695, %v654_v46  ;;  %v663_v52 = vmul.f32 1.442695, %v646_v32  ;;  %v2377_v17 = vmax.f32 %v565_v53, %v582_v63  ;;  %v2379_v34 = vmax.f32 %v568_v14, %v588_v16  ;;  %v580_v18 = vld [vmem:[#allocation2 + $0x78] sm:$0xff] }
 0x1ad   :  { %3010 = vst [vmem:[#allocation18_spill] sm:$0xff] %v2377_v17  ;;  %3011 = vst [vmem:[#allocation19_spill] sm:$0xff] %v2379_v34  ;;  %1600 = vpow2.f32 %v679_v47  ;;  %v645_v22 = vsub.f32 %v565_v53, %v2377_v17  ;;  %v648_v59 = vsub.f32 %v568_v14, %v2379_v34  ;;  %711 = vperm.xlu0 %1599, %v2377_v17   ;;  %v575_v53 = vld [vmem:[#allocation2 + $0x50] sm:$0xff]  ;;  %vm629_vm14 = vcmp.gt.f32.partialorder %v2377_v17, -inf }
 0x1ae   :  { %949 = vst.msk [vmem:[#allocation2] sm:$0xff] %vm3012_vm7, %v2377_v17  ;;  %1602 = vpow2.f32 %v663_v52  ;;  %v598_v46 = vpop.xlane.xlu0 %597  ;;  %v604_v32 = vpop.xlane.xlu1 %603  ;;  %vm3023_vm7 = vmmov %vm2984_vm1 }
 0x1af   :  { %952 = vst.msk [vmem:[#allocation2 + $0x18] sm:$0xff] %vm3013_vm12, %v2379_v34  ;;  %v661_v16 = vmul.f32 1.442695, %v645_v22  ;;  %v667_v63 = vmul.f32 1.442695, %v648_v59  ;;  %v2388_v39 = vmax.f32 %v573_v28, %v598_v46  ;;  %v2390_v47 = vmax.f32 %v576_v49, %v604_v32  ;;  %vm3024_vm12 = vmmov %vm2984_vm1 }
 0x1b1   :  { %1604 = vpow2.f32 %v661_v16  ;;  %v653_v45 = vsub.f32 %v573_v28, %v2388_v39  ;;  %957 = vst.msk [vmem:[#allocation2 + $0x40] sm:$0xff] %vm3014_vm3, %v2388_v39  ;;  %v656_v14 = vsub.f32 %v576_v49, %v2390_v47  ;;  %751 = vperm.xlu1 %1598, %v2388_v39   ;;  %766 = vperm.xlu0 %1599, %v2390_v47   ;;  %v570_v16 = vld [vmem:[#allocation2 + $0x28] sm:$0xff]  ;;  %vm632_vm3 = vcmp.gt.f32.partialorder %v2379_v34, -inf }
 0x1b2   :  { %960 = vst.msk [vmem:[#allocation2 + $0x58] sm:$0xff] %vm3015_vm5, %v2390_v47  ;;  %1606 = vpow2.f32 %v667_v63  ;;  %v602_v52 = vpop.xlane.xlu0 %601  ;;  %v586_v59 = vpop.xlane.xlu1 %585  ;;  %vm637_vm5 = vcmp.gt.f32.partialorder %v2388_v39, -inf }
 0x1b3   :  { %v677_v22 = vmul.f32 1.442695, %v653_v45  ;;  %v683_v46 = vmul.f32 1.442695, %v656_v14  ;;  %v2400_v32 = vmax.f32 %v575_v53, %v602_v52  ;;  %v2402_v28 = vmax.f32 %v567_v9, %v586_v59 }
 0x1b5   :  { %1608 = vpow2.f32 %v677_v22  ;;  %v655_v49 = vsub.f32 %v575_v53, %v2400_v32  ;;  %959 = vst.msk [vmem:[#allocation2 + $0x50] sm:$0xff] %vm3016_vm13, %v2400_v32  ;;  %v647_v30 = vsub.f32 %v567_v9, %v2402_v28  ;;  %726 = vperm.xlu1 %1598, %v2379_v34   ;;  %v577_v9 = vld [vmem:[#allocation2 + $0x60] sm:$0xff]  ;;  %vm3026_vm13 = vmmov %vm2984_vm1 }
 0x1b6   :  { %951 = vst.msk [vmem:[#allocation2 + $0x10] sm:$0xff] %vm3017_vm10, %v2402_v28  ;;  %1610 = vpow2.f32 %v683_v46  ;;  %v592_v45 = vpop.xlane.xlu1 %591  ;;  %v590_v63 = vpop.xlane.xlu0 %589  ;;  %vm3027_vm10 = vmmov %vm2984_vm1 }
 0x1b7   :  { %v1601_v14 = vpop.eup %1600  ;;  %v681_v52 = vmul.f32 1.442695, %v655_v49  ;;  %v665_v59 = vmul.f32 1.442695, %v647_v30  ;;  %v2412_v22 = vmax.f32 %v570_v16, %v592_v45  ;;  %v2414_v53 = vmax.f32 %v569_v27, %v590_v63 }
 0x1b8   :  { %v1603_v55 = vpop.eup %1602  ;;  %v2418_v0 = vsel %vm638_vm4, %v1601_v14, 0.0 }
 0x1b9   :  { %3018 = vst [vmem:[#allocation20_spill] sm:$0xff] %v2418_v0  ;;  %1612 = vpow2.f32 %v681_v52  ;;  %v650_v46 = vsub.f32 %v570_v16, %v2412_v22  ;;  %954 = vst.msk [vmem:[#allocation2 + $0x28] sm:$0xff] %vm2984_vm1, %v2412_v22  ;;  %v649_v49 = vsub.f32 %v569_v27, %v2414_v53  ;;  %721 = vperm.xlu1 %1598, %v2402_v28   ;;  %v2430_v63 = vsel %vm630_vm8, %v1603_v55, 0.0 }
 0x1ba   :  { %953 = vst.msk [vmem:[#allocation2 + $0x20] sm:$0xff] %vm3019_vm15, %v2414_v53  ;;  %1614 = vpow2.f32 %v665_v59  ;;  %v608_v30 = vpop.xlane.xlu1 %607  ;;  %v606_v45 = vpop.xlane.xlu0 %605  ;;  %3020 = vst [vmem:[#allocation21_spill] sm:$0xff] %v2430_v63  ;;  %v579_v63 = vld [vmem:[#allocation2 + $0x70] sm:$0xff]  ;;  %vm640_vm1 = vcmp.gt.f32.partialorder %v2390_v47, -inf  ;;  %vm2864_vm15 = vcmp.gt.f32.partialorder %v2400_v32, -inf  ;;  %v874_v47 = vld [vmem:[#allocation3 + $0x28] sm:$0xff] }
 0x1bb   :  { %v1605_v16 = vpop.eup %1604  ;;  %v671_v14 = vmul.f32 1.442695, %v650_v46  ;;  %v669_v52 = vmul.f32 1.442695, %v649_v49  ;;  %v2433_v27 = vmax.f32 %v578_v40, %v608_v30  ;;  %v2435_v61 = vmax.f32 %v577_v9, %v606_v45 }
 0x1bc   :  { %v1607_v0 = vpop.eup %1606  ;;  %v2439_v59 = vsel %vm629_vm14, %v1605_v16, 0.0 }
 0x1bd   :  { %3021 = vst [vmem:[#allocation22_spill] sm:$0xff] %v2435_v61  ;;  %3022 = vst [vmem:[#allocation23_spill] sm:$0xff] %v2439_v59  ;;  %1616 = vpow2.f32 %v671_v14  ;;  %v658_v55 = vsub.f32 %v578_v40, %v2433_v27  ;;  %v657_v46 = vsub.f32 %v577_v9, %v2435_v61  ;;  %761 = vperm.xlu1 %1598, %v2400_v32   ;;  %776 = vperm.xlu0 %1599, %v2433_v27  }
 0x1be   :  { %962 = vst.msk [vmem:[#allocation2 + $0x68] sm:$0xff] %vm3023_vm7, %v2433_v27  ;;  %1618 = vpow2.f32 %v669_v52  ;;  %v596_v49 = vpop.xlane.xlu1 %595  ;;  %v594_v30 = vpop.xlane.xlu0 %593  ;;  %v2453_v40 = vsel %vm632_vm3, %v1607_v0, 0.0  ;;  %vm631_vm7 = vcmp.gt.f32.partialorder %v2402_v28, -inf }
 0x1bf   :  { %961 = vst.msk [vmem:[#allocation2 + $0x60] sm:$0xff] %vm3024_vm12, %v2435_v61  ;;  %v1609_v45 = vpop.eup %1608  ;;  %v687_v9 = vmul.f32 1.442695, %v658_v55  ;;  %v685_v16 = vmul.f32 1.442695, %v657_v46  ;;  %v2455_v14 = vmax.f32 %v572_v38, %v596_v49  ;;  %v2457_v17 = vmax.f32 %v571_v10, %v594_v30  ;;  %vm3028_vm12 = vmmov %vm3027_vm10 }
 0x1c0   :  { %v1611_v59 = vpop.eup %1610  ;;  %v2461_v52 = vsel %vm637_vm5, %v1609_v45, 0.0 }
 0x1c1   :  { %3025 = vst [vmem:[#allocation24_spill] sm:$0xff] %v2457_v17  ;;  %1620 = vpow2.f32 %v687_v9  ;;  %v652_v51 = vsub.f32 %v572_v38, %v2455_v14  ;;  %956 = vst.msk [vmem:[#allocation2 + $0x38] sm:$0xff] %vm3026_vm13, %v2455_v14  ;;  %v651_v0 = vsub.f32 %v571_v10, %v2457_v17  ;;  %736 = vperm.xlu1 %1598, %v2412_v22   ;;  %v2473_v49 = vsel %vm640_vm1, %v1611_v59, 0.0 }
 0x1c2   :  { %955 = vst.msk [vmem:[#allocation2 + $0x30] sm:$0xff] %vm3027_vm10, %v2457_v17  ;;  %1622 = vpow2.f32 %v685_v16  ;;  %v612_v55 = vpop.xlane.xlu1 %611  ;;  %v610_v46 = vpop.xlane.xlu0 %609  ;;  %vm3029_vm13 = vmmov %vm3027_vm10  ;;  %vm2862_vm10 = vcmp.gt.f32.partialorder %v2412_v22, -inf }
 0x1c3   :  { %v1613_v38 = vpop.eup %1612  ;;  %v675_v30 = vmul.f32 1.442695, %v652_v51  ;;  %v673_v45 = vmul.f32 1.442695, %v651_v0  ;;  %v2476_v10 = vmax.f32 %v580_v18, %v612_v55  ;;  %v2478_v9 = vmax.f32 %v579_v63, %v610_v46 }
 0x1c4   :  { %v1615_v34 = vpop.eup %1614  ;;  %v2483_v16 = vsel %vm2864_vm15, %v1613_v38, 0.0  ;;  %vm635_vm15 = vcmp.gt.f32.partialorder %v2457_v17, -inf }
 0x1c5   :  { %1624 = vpow2.f32 %v675_v30  ;;  %v660_v59 = vsub.f32 %v580_v18, %v2476_v10  ;;  %964 = vst.msk [vmem:[#allocation2 + $0x78] sm:$0xff] %vm3028_vm12, %v2476_v10  ;;  %v659_v51 = vsub.f32 %v579_v63, %v2478_v9  ;;  %731 = vperm.xlu1 %1598, %v2414_v53   ;;  %786 = vperm.xlu0 %1599, %v2476_v10   ;;  %v2495_v0 = vsel %vm631_vm7, %v1615_v34, 0.0 }
 0x1c6   :  { %963 = vst.msk [vmem:[#allocation2 + $0x70] sm:$0xff] %vm3029_vm13, %v2478_v9  ;;  %1626 = vpow2.f32 %v673_v45  ;;  %vm2863_vm12 = vcmp.gt.f32.partialorder %v2414_v53, -inf  ;;  %vm2865_vm13 = vcmp.gt.f32.partialorder %v2433_v27, -inf }
 0x1c7   :  { %v1617_v55 = vpop.eup %1616  ;;  %v691_v46 = vmul.f32 1.442695, %v660_v59  ;;  %v689_v18 = vmul.f32 1.442695, %v659_v51 }
 0x1c8   :  { %v1619_v38 = vpop.eup %1618  ;;  %v2500_v63 = vsel %vm2862_vm10, %v1617_v55, 0.0  ;;  %vm2866_vm10 = vcmp.gt.f32.partialorder %v2435_v61, -inf }
 0x1c9   :  { %1628 = vpow2.f32 %v691_v46  ;;  %771 = vperm.xlu1 %1598, %v2435_v61   ;;  %v2506_v34 = vsel %vm2863_vm12, %v1619_v38, 0.0  ;;  %vm636_vm12 = vcmp.gt.f32.partialorder %v2455_v14, -inf }
 0x1ca   :  { %1630 = vpow2.f32 %v689_v18 }
 0x1cb   :  { %v1621_v30 = vpop.eup %1620 }
 0x1cc   :  { %v1623_v45 = vpop.eup %1622  ;;  %v2511_v59 = vsel %vm2865_vm13, %v1621_v30, 0.0  ;;  %vm644_vm13 = vcmp.gt.f32.partialorder %v2476_v10, -inf }
 0x1cd   :  { %746 = vperm.xlu1 %1598, %v2455_v14   ;;  %v2517_v51 = vsel %vm2866_vm10, %v1623_v45, 0.0  ;;  %vm643_vm10 = vcmp.gt.f32.partialorder %v2478_v9, -inf }
 0x1cf   :  { %v1625_v55 = vpop.eup %1624 }
 0x1d0   :  { %v1627_v46 = vpop.eup %1626  ;;  %v2522_v18 = vsel %vm636_vm12, %v1625_v55, 0.0 }
 0x1d1   :  { %741 = vperm.xlu1 %1598, %v2457_v17   ;;  %v2529_v38 = vsel %vm635_vm15, %v1627_v46, 0.0  ;;  %v3030_v17 = vsel %vm1923_vm6, %v2013_v48, 0.0  ;;  %v3031_v46 = vsel %vm1962_vm0, %v2109_v15, 0.0  ;;  %vm3035_vm6 = vnez %v2898_v35 }
 0x1d2   :  { %v3036_v54 = vsel %vm3035_vm6, %v2074_v2, 0.0  ;;  %vm3037_vm0 = vnez %v2924_v6  ;;  %vm3045_vm6 = vnez %v2902_v41  ;;  %v3060_v41 = vld [vmem:[#allocation9_spill] sm:$0xff] }
 0x1d3   :  { %v1629_v30 = vpop.eup %1628  ;;  %v3038_v48 = vsel %vm3037_vm0, %v2154_v13, 0.0 }
 0x1d4   :  { %v1631_v45 = vpop.eup %1630  ;;  %v2534_v61 = vsel %vm644_vm13, %v1629_v30, 0.0  ;;  %v3032_v30 = vsel %vm2062_vm9, %v2170_v56, 0.0  ;;  %vm3039_vm9 = vnez %v2950_v3 }
 0x1d5   :  { %781 = vperm.xlu1 %1598, %v2478_v9   ;;  %v2539_v55 = vsel %vm643_vm10, %v1631_v45, 0.0  ;;  %v3033_v45 = vsel %vm2228_vm2, %v2260_v33, 0.0  ;;  %v3040_v62 = vsel %vm3039_vm9, %v2248_v23, 0.0  ;;  %vm3043_vm2 = vnez %v2915_v60  ;;  %v3056_v60 = vld [vmem:[#allocation12_spill] sm:$0xff] }
 0x1d6   :  { %vm3053_vm9 = vnez %v3052_v31 }
 0x1e4   :  { %406 = vadd.xlane.f32.xlu0 %v3030_v17 }
 0x1e8   :  { %410 = vadd.xlane.f32.xlu0 %v3031_v46 }
 0x1ec   :  { %414 = vadd.xlane.f32.xlu0 %v3032_v30 }
 0x1f0   :  { %418 = vadd.xlane.f32.xlu0 %v3033_v45 }
 0x1f9   :  { %408 = vadd.xlane.f32.xlu1 %v3034_v8 }
 0x1fd   :  { %412 = vadd.xlane.f32.xlu1 %v3036_v54 }
 0x201   :  { %416 = vadd.xlane.f32.xlu1 %v3038_v48 }
 0x205   :  { %420 = vadd.xlane.f32.xlu1 %v3040_v62 }
 0x228   :  { %v717_v15 = vpop.permute.xlu1 %716  ;;  %v757_v21 = vpop.permute.xlu0 %756 }
 0x229   :  { %v790_v43 = vsub.f32 %v2023_v50, %v717_v15  ;;  %v798_v56 = vsub.f32 %v2018_v58, %v757_v21 }
 0x22b   :  { %v807_v35 = vmul.f32 1.442695, %v790_v43  ;;  %v823_v5 = vmul.f32 1.442695, %v798_v56 }
 0x22c   :  { %v712_v2 = vpop.permute.xlu0 %711 }
 0x22d   :  { %1632 = vpow2.f32 %v807_v35  ;;  %v789_v6 = vsub.f32 %v2102_v11, %v712_v2 }
 0x22e   :  { %1634 = vpow2.f32 %v823_v5 }
 0x22f   :  { %v805_v13 = vmul.f32 1.442695, %v789_v6 }
 0x230   :  { %v752_v33 = vpop.permute.xlu1 %751  ;;  %v767_v23 = vpop.permute.xlu0 %766 }
 0x231   :  { %1636 = vpow2.f32 %v805_v13  ;;  %v797_v3 = vsub.f32 %v2168_v29, %v752_v33  ;;  %v800_v46 = vsub.f32 %v2139_v26, %v767_v23 }
 0x233   :  { %v821_v17 = vmul.f32 1.442695, %v797_v3  ;;  %v827_v54 = vmul.f32 1.442695, %v800_v46 }
 0x234   :  { %v727_v30 = vpop.permute.xlu1 %726 }
 0x235   :  { %1638 = vpow2.f32 %v821_v17  ;;  %v792_v58 = vsub.f32 %v2107_v12, %v727_v30 }
 0x237   :  { %v1633_v50 = vpop.eup %1632  ;;  %v811_v45 = vmul.f32 1.442695, %v792_v58 }
 0x238   :  { %v1635_v8 = vpop.eup %1634  ;;  %v722_v48 = vpop.permute.xlu1 %721  ;;  %839 = vadd.xlane.f32.xlu0 %v1633_v50 }
 0x239   :  { %1640 = vpow2.f32 %v811_v45  ;;  %v791_v11 = vsub.f32 %v2258_v36, %v722_v48  ;;  %855 = vadd.xlane.f32.xlu1 %v1635_v8 }
 0x23a   :  { %1642 = vpow2.f32 %v827_v54 }
 0x23b   :  { %v1637_v62 = vpop.eup %1636  ;;  %v809_v29 = vmul.f32 1.442695, %v791_v11 }
 0x23c   :  { %v762_v15 = vpop.permute.xlu1 %761  ;;  %v777_v21 = vpop.permute.xlu0 %776 }
 0x23d   :  { %1644 = vpow2.f32 %v809_v29  ;;  %v799_v26 = vsub.f32 %v2214_v57, %v762_v15  ;;  %837 = vadd.xlane.f32.xlu1 %v1637_v62  ;;  %v802_v56 = vsub.f32 %v2302_v20, %v777_v21 }
 0x23f   :  { %v1639_v12 = vpop.eup %1638  ;;  %v825_v43 = vmul.f32 1.442695, %v799_v26  ;;  %v831_v6 = vmul.f32 1.442695, %v802_v56  ;;  %v3042_v56 = vsel %vm3041_vm11, %v2002_v44, 0.0  ;;  %v3054_v44 = vld [vmem:[#allocation8_spill] sm:$0xff]  ;;  %vm3057_vm11 = vnez %v3056_v60 }
 0x240   :  { %v737_v35 = vpop.permute.xlu1 %736  ;;  %853 = vadd.xlane.f32.xlu0 %v1639_v12  ;;  %v878_v60 = vld [vmem:[#allocation3 + $0x48] sm:$0xff] }
 0x241   :  { %1646 = vpow2.f32 %v825_v43  ;;  %v794_v5 = vsub.f32 %v2282_v24, %v737_v35  ;;  %v3046_v35 = vld [vmem:[#allocation5_spill] sm:$0xff] }
 0x243   :  { %v1641_v36 = vpop.eup %1640  ;;  %v815_v2 = vmul.f32 1.442695, %v794_v5  ;;  %v3047_v5 = vsel %vm3045_vm6, %v3046_v35, 0.0  ;;  %vm3064_vm6 = vcmask 7168  }
 0x244   :  { %v732_v13 = vpop.permute.xlu1 %731  ;;  %843 = vadd.xlane.f32.xlu1 %v1641_v36  ;;  %v1643_v57 = vpop.eup %1642  ;;  %v3048_v36 = vld [vmem:[#allocation7_spill] sm:$0xff] }
 0x245   :  { %1648 = vpow2.f32 %v815_v2  ;;  %v793_v33 = vsub.f32 %v2287_v42, %v732_v13  ;;  %v787_v20 = vpop.permute.xlu0 %786  ;;  %vm3049_vm0 = vnez %v3048_v36  ;;  %v3050_v2 = vld [vmem:[#allocation10_spill] sm:$0xff]  ;;  %v3055_v13 = vsel %vm3053_vm9, %v3054_v44, 0.0  ;;  %vm3069_vm9 = vmmov %vm3064_vm6  ;;  %v257_v36 = vld [vmem:[#allocation4 + $0x38] sm:$0xff] }
 0x246   :  { %1650 = vpow2.f32 %v831_v6  ;;  %v804_v58 = vsub.f32 %v2326_v25, %v787_v20  ;;  %v3051_v6 = vsel %vm3049_vm0, %v3050_v2, 0.0 }
 0x247   :  { %v1645_v3 = vpop.eup %1644  ;;  %v813_v23 = vmul.f32 1.442695, %v793_v33  ;;  %v250_v33 = vld [vmem:[#allocation4] sm:$0xff] }
 0x248   :  { %v772_v17 = vpop.permute.xlu1 %771  ;;  %859 = vadd.xlane.f32.xlu1 %v1643_v57  ;;  %841 = vadd.xlane.f32.xlu0 %v1645_v3  ;;  %v835_v54 = vmul.f32 1.442695, %v804_v58  ;;  %v3062_v3 = vld [vmem:[#allocation11_spill] sm:$0xff] }
 0x249   :  { %1652 = vpow2.f32 %v813_v23  ;;  %v801_v46 = vsub.f32 %v2305_v1, %v772_v17 }
 0x24b   :  { %v1647_v24 = vpop.eup %1646  ;;  %v829_v30 = vmul.f32 1.442695, %v801_v46  ;;  %v252_v46 = vld [vmem:[#allocation4 + $0x10] sm:$0xff] }
 0x24c   :  { %v747_v50 = vpop.permute.xlu1 %746  ;;  %857 = vadd.xlane.f32.xlu0 %v1647_v24  ;;  %v3065_v24 = vld [vmem:[#allocation13_spill] sm:$0xff] }
 0x24d   :  { %1654 = vpow2.f32 %v829_v30  ;;  %v796_v42 = vsub.f32 %v2314_v37, %v747_v50  ;;  %vm3066_vm0 = vnez %v3065_v24  ;;  %v3067_v30 = vld [vmem:[#allocation15_spill] sm:$0xff]  ;;  %v890_v24 = vmul.f32 %v874_v47, %v2500_v63 }
 0x24e   :  { %v3068_v58 = vsel %vm3066_vm0, %v3067_v30, 0.0 }
 0x24f   :  { %v1649_v45 = vpop.eup %1648  ;;  %v819_v8 = vmul.f32 1.442695, %v796_v42 }
 0x250   :  { %v742_v48 = vpop.permute.xlu1 %741  ;;  %847 = vadd.xlane.f32.xlu1 %v1649_v45  ;;  %v1651_v62 = vpop.eup %1650  ;;  %v254_v45 = vld [vmem:[#allocation4 + $0x20] sm:$0xff] }
 0x251   :  { %1656 = vpow2.f32 %v819_v8  ;;  %v795_v11 = vsub.f32 %v2317_v7, %v742_v48 }
 0x252   :  { %1658 = vpow2.f32 %v835_v54 }
 0x253   :  { %v1653_v29 = vpop.eup %1652  ;;  %v817_v1 = vmul.f32 1.442695, %v795_v11  ;;  %v256_v11 = vld [vmem:[#allocation4 + $0x30] sm:$0xff] }
 0x254   :  { %v782_v15 = vpop.permute.xlu1 %781  ;;  %863 = vadd.xlane.f32.xlu1 %v1651_v62  ;;  %845 = vadd.xlane.f32.xlu0 %v1653_v29 }
 0x255   :  { %1660 = vpow2.f32 %v817_v1  ;;  %v803_v25 = vsub.f32 %v2329_v19, %v782_v15  ;;  %v3044_v19 = vsel %vm3043_vm2, %v2076_v4, 0.0  ;;  %v3058_v4 = vld [vmem:[#allocation14_spill] sm:$0xff]  ;;  %vm3061_vm2 = vnez %v3060_v41 }
 0x256   :  { %v3059_v57 = vsel %vm3057_vm11, %v3058_v4, 0.0  ;;  %v3063_v23 = vsel %vm3061_vm2, %v3062_v3, 0.0  ;;  %vm3070_vm11 = vmmov %vm3064_vm6  ;;  %v3082_v4 = vld [vmem:[#allocation21_spill] sm:$0xff]  ;;  %v3083_v3 = vld [vmem:[#allocation20_spill] sm:$0xff] }
 0x257   :  { %v1655_v26 = vpop.eup %1654  ;;  %v833_v37 = vmul.f32 1.442695, %v803_v25  ;;  %vm3071_vm2 = vmmov %vm3064_vm6  ;;  %v251_v25 = vld [vmem:[#allocation4 + $0x8] sm:$0xff] }
 0x258   :  { %861 = vadd.xlane.f32.xlu0 %v1655_v26  ;;  %vm3073_vm0 = vmmov %vm3071_vm2 }
 0x259   :  { %1662 = vpow2.f32 %v833_v37 }
 0x25b   :  { %v1657_v21 = vpop.eup %1656 }
 0x25c   :  { %851 = vadd.xlane.f32.xlu1 %v1657_v21  ;;  %v1659_v12 = vpop.eup %1658 }
 0x25f   :  { %v1661_v43 = vpop.eup %1660 }
 0x260   :  { %867 = vadd.xlane.f32.xlu1 %v1659_v12  ;;  %849 = vadd.xlane.f32.xlu0 %v1661_v43  ;;  %v253_v12 = vld [vmem:[#allocation4 + $0x18] sm:$0xff] }
 0x263   :  { %v1663_v7 = vpop.eup %1662 }
 0x264   :  { %424 = vadd.xlane.f32.xlu1 %v3042_v56  ;;  %865 = vadd.xlane.f32.xlu0 %v1663_v7  ;;  %v255_v56 = vld [vmem:[#allocation4 + $0x28] sm:$0xff] }
 0x268   :  { %428 = vadd.xlane.f32.xlu1 %v3044_v19  ;;  %422 = vadd.xlane.f32.xlu0 %v3047_v5 }
 0x26c   :  { %432 = vadd.xlane.f32.xlu1 %v3051_v6  ;;  %426 = vadd.xlane.f32.xlu0 %v3055_v13 }
 0x270   :  { %436 = vadd.xlane.f32.xlu1 %v3059_v57  ;;  %430 = vadd.xlane.f32.xlu0 %v3063_v23  ;;  %v894_v23 = vmul.f32 %v878_v60, %v3083_v3 }
 0x271   :  { %v407_v17 = vpop.xlane.xlu0 %406 }
 0x272   :  { %v438_v20 = vadd.f32 %v407_v17, %v250_v33  ;;  %v870_v33 = vld [vmem:[#allocation3 + $0x8] sm:$0xff] }
 0x273   :  { %v886_v57 = vmul.f32 %v870_v33, %v3082_v4 }
 0x274   :  { %455 = vst.msk [vmem:[#allocation4] sm:$0xff] %vm3064_vm6, %v438_v20  ;;  %434 = vadd.xlane.f32.xlu0 %v3068_v58  ;;  %vm3072_vm6 = vmmov %vm3071_vm2  ;;  %v1324_v20 = vld [vmem:[#allocation2 + $0x8] sm:$0xff] }
 0x275   :  { %v411_v50 = vpop.xlane.xlu0 %410 }
 0x276   :  { %v440_v42 = vadd.f32 %v411_v50, %v252_v46  ;;  %v869_v50 = vld [vmem:[#allocation3] sm:$0xff] }
 0x278   :  { %457 = vst.msk [vmem:[#allocation4 + $0x10] sm:$0xff] %vm3069_vm9, %v440_v42  ;;  %vm3074_vm9 = vmmov %vm3073_vm0 }
 0x279   :  { %v415_v8 = vpop.xlane.xlu0 %414 }
 0x27a   :  { %v442_v54 = vadd.f32 %v415_v8, %v254_v45  ;;  %v3088_v45 = vld [vmem:[#allocation23_spill] sm:$0xff] }
 0x27b   :  { %v1419_v48 = vld [vmem:[#allocation4] sm:$0xff]  ;;  %v885_v8 = vmul.f32 %v869_v50, %v3088_v45  ;;  %v882_v50 = vld [vmem:[#allocation3 + $0x68] sm:$0xff] }
 0x27c   :  { %1435 = vst.msk [vmem:[%s2832_s4] sm:$0xff] %vm3070_vm11, %v1419_v48  ;;  %vm3075_vm11 = vmmov %vm3073_vm0  ;;  %v877_v48 = vld [vmem:[#allocation3 + $0x40] sm:$0xff] }
 0x27d   :  { %459 = vst.msk [vmem:[#allocation4 + $0x20] sm:$0xff] %vm3071_vm2, %v442_v54  ;;  %v419_v62 = vpop.xlane.xlu0 %418  ;;  %vm3076_vm2 = vmmov %vm3073_vm0 }
 0x27e   :  { %v444_v29 = vadd.f32 %v419_v62, %v256_v11 }
 0x27f   :  { %v1421_v1 = vld [vmem:[#allocation4 + $0x10] sm:$0xff] }
 0x280   :  { %1437 = vst.msk [vmem:[%s2832_s4 + $0x10] sm:$0xff] %vm3072_vm6, %v1421_v1  ;;  %vm3077_vm6 = vmmov %vm3073_vm0  ;;  %v893_v1 = vmul.f32 %v877_v48, %v2461_v52 }
 0x281   :  { %461 = vst.msk [vmem:[#allocation4 + $0x30] sm:$0xff] %vm3073_vm0, %v444_v29 }
 0x284   :  { %v1423_v15 = vld [vmem:[#allocation4 + $0x20] sm:$0xff] }
 0x285   :  { %1439 = vst.msk [vmem:[%s2832_s4 + $0x20] sm:$0xff] %vm3074_vm9, %v1423_v15  ;;  %vm3078_vm9 = vmmov %vm3073_vm0 }
 0x286   :  { %v409_v26 = vpop.xlane.xlu1 %408 }
 0x287   :  { %v439_v21 = vadd.f32 %v409_v26, %v251_v25  ;;  %v872_v26 = vld [vmem:[#allocation3 + $0x18] sm:$0xff] }
 0x288   :  { %v1425_v37 = vld [vmem:[#allocation4 + $0x30] sm:$0xff] }
 0x289   :  { %1441 = vst.msk [vmem:[%s2832_s4 + $0x30] sm:$0xff] %vm3075_vm11, %v1425_v37  ;;  %vm3079_vm11 = vmmov %vm3073_vm0 }
 0x28a   :  { %456 = vst.msk [vmem:[#allocation4 + $0x8] sm:$0xff] %vm3076_vm2, %v439_v21  ;;  %v413_v43 = vpop.xlane.xlu1 %412  ;;  %vm3080_vm2 = vmmov %vm3073_vm0 }
 0x28b   :  { %v441_v7 = vadd.f32 %v413_v43, %v253_v12  ;;  %v888_v43 = vmul.f32 %v872_v26, %v2453_v40 }
 0x28d   :  { %458 = vst.msk [vmem:[#allocation4 + $0x18] sm:$0xff] %vm3077_vm6, %v441_v7  ;;  %vm3081_vm6 = vmmov %vm3073_vm0 }
 0x28e   :  { %v417_v19 = vpop.xlane.xlu1 %416 }
 0x28f   :  { %v443_v35 = vadd.f32 %v417_v19, %v255_v56  ;;  %v880_v19 = vld [vmem:[#allocation3 + $0x58] sm:$0xff] }
 0x290   :  { %v896_v39 = vmul.f32 %v880_v19, %v2473_v49  ;;  %v3106_v19 = vld [vmem:[#allocation22_spill] sm:$0xff] }
 0x291   :  { %v1420_v5 = vld [vmem:[#allocation4 + $0x8] sm:$0xff]  ;;  %460 = vst.msk [vmem:[#allocation4 + $0x28] sm:$0xff] %vm3078_vm9, %v443_v35  ;;  %vm3086_vm9 = vmmov %vm3073_vm0  ;;  %v871_v35 = vld [vmem:[#allocation3 + $0x10] sm:$0xff] }
 0x292   :  { %1436 = vst.msk [vmem:[%s2832_s4 + $0x8] sm:$0xff] %vm3073_vm0, %v1420_v5  ;;  %v421_v2 = vpop.xlane.xlu1 %420 }
 0x293   :  { %v445_v6 = vadd.f32 %v421_v2, %v257_v36 }
 0x294   :  { %v1422_v31 = vld [vmem:[#allocation4 + $0x18] sm:$0xff] }
 0x295   :  { %1438 = vst.msk [vmem:[%s2832_s4 + $0x18] sm:$0xff] %vm3079_vm11, %v1422_v31  ;;  %vm3087_vm11 = vmmov %vm3073_vm0 }
 0x296   :  { %462 = vst.msk [vmem:[#allocation4 + $0x38] sm:$0xff] %vm3080_vm2, %v445_v6  ;;  %v887_v6 = vmul.f32 %v871_v35, %v2495_v0  ;;  %vm3096_vm2 = vcmp.gt.f32.partialorder %v2400_v32, -inf }
 0x298   :  { %v1424_v44 = vld [vmem:[#allocation4 + $0x28] sm:$0xff] }
 0x299   :  { %1440 = vst.msk [vmem:[%s2832_s4 + $0x28] sm:$0xff] %vm3081_vm6, %v1424_v44  ;;  %vm3099_vm6 = vmmov %vm3073_vm0 }
 0x29d   :  { %v1426_v13 = vld [vmem:[#allocation4 + $0x38] sm:$0xff] }
 0x29e   :  { %1442 = vst.msk [vmem:[%s2832_s4 + $0x38] sm:$0xff] %vm3073_vm0, %v1426_v13  ;;  %v879_v13 = vld [vmem:[#allocation3 + $0x50] sm:$0xff] }
 0x29f   :  { %v895_v49 = vmul.f32 %v879_v13, %v2483_v16 }
 0x2c5   :  { %v840_v41 = vpop.xlane.xlu0 %839 }
 0x2c6   :  { %v856_v17 = vpop.xlane.xlu1 %855  ;;  %v902_v46 = vsel %vm630_vm8, %v840_v41, 0.0  ;;  %vm3090_vm8 = vmmov %vm3073_vm0 }
 0x2c7   :  { %v910_v30 = vsel %vm638_vm4, %v856_v17, 0.0  ;;  %v918_v58 = vadd.f32 %v902_v46, %v886_v57  ;;  %vm3091_vm4 = vmmov %vm3073_vm0 }
 0x2c8   :  { %v926_v42 = vadd.f32 %v910_v30, %v894_v23 }
 0x2c9   :  { %934 = vst.msk [vmem:[#allocation3 + $0x8] sm:$0xff] %vm3086_vm9, %v918_v58  ;;  %v1332_v58 = vld [vmem:[#allocation2 + $0x48] sm:$0xff]  ;;  %vm3100_vm9 = vmmov %vm3073_vm0 }
 0x2ca   :  { %942 = vst.msk [vmem:[#allocation3 + $0x48] sm:$0xff] %vm3087_vm11, %v926_v42  ;;  %v838_v54 = vpop.xlane.xlu1 %837  ;;  %v873_v42 = vld [vmem:[#allocation3 + $0x20] sm:$0xff]  ;;  %vm3101_vm11 = vcmp.gt.f32.partialorder %v2433_v27, -inf }
 0x2cb   :  { %v901_v62 = vsel %vm629_vm14, %v838_v54, 0.0  ;;  %vm3093_vm14 = vmmov %vm3073_vm0 }
 0x2cc   :  { %v917_v29 = vadd.f32 %v901_v62, %v885_v8 }
 0x2cd   :  { %v854_v15 = vpop.xlane.xlu0 %853 }
 0x2ce   :  { %933 = vst.msk [vmem:[#allocation3] sm:$0xff] %vm3090_vm8, %v917_v29  ;;  %v909_v25 = vsel %vm637_vm5, %v854_v15, 0.0  ;;  %vm3095_vm5 = vmmov %vm3073_vm0  ;;  %v889_v29 = vmul.f32 %v873_v42, %v2506_v34  ;;  %v1323_v15 = vld [vmem:[#allocation2] sm:$0xff]  ;;  %vm3102_vm8 = vcmp.gt.f32.partialorder %v2414_v53, -inf }
 0x2cf   :  { %v925_v37 = vadd.f32 %v909_v25, %v893_v1 }
 0x2d0   :  { %v1340_v21 = vld [vmem:[#allocation3 + $0x8] sm:$0xff] }
 0x2d1   :  { %v1348_v12 = vld [vmem:[#allocation3 + $0x48] sm:$0xff]  ;;  %1664 = vlog2.f32 %v1340_v21  ;;  %941 = vst.msk [vmem:[#allocation3 + $0x40] sm:$0xff] %vm3091_vm4, %v925_v37  ;;  %v844_v7 = vpop.xlane.xlu1 %843  ;;  %v881_v37 = vld [vmem:[#allocation3 + $0x60] sm:$0xff]  ;;  %vm3103_vm4 = vmmov %vm3073_vm0 }
 0x2d2   :  { %1666 = vlog2.f32 %v1348_v12  ;;  %v904_v52 = vsel %vm632_vm3, %v844_v7, 0.0  ;;  %vm3094_vm3 = vmmov %vm3073_vm0  ;;  %v897_v53 = vmul.f32 %v881_v37, %v2517_v51 }
 0x2d3   :  { %v920_v5 = vadd.f32 %v904_v52, %v888_v43 }
 0x2d5   :  { %v1339_v36 = vld [vmem:[#allocation3] sm:$0xff]  ;;  %936 = vst.msk [vmem:[#allocation3 + $0x18] sm:$0xff] %vm3093_vm14, %v920_v5  ;;  %v860_v2 = vpop.xlane.xlu1 %859  ;;  %v842_v31 = vpop.xlane.xlu0 %841  ;;  %vm3104_vm14 = vmmov %vm3073_vm0  ;;  %v876_v5 = vld [vmem:[#allocation3 + $0x38] sm:$0xff] }
 0x2d6   :  { %1668 = vlog2.f32 %v1339_v36  ;;  %v912_v40 = vsel %vm640_vm1, %v860_v2, 0.0  ;;  %v903_v44 = vsel %vm631_vm7, %v842_v31, 0.0  ;;  %vm3097_vm1 = vmmov %vm3073_vm0  ;;  %vm3098_vm7 = vcmp.gt.f32.partialorder %v2412_v22, -inf  ;;  %v1326_v31 = vld [vmem:[#allocation2 + $0x18] sm:$0xff] }
 0x2d7   :  { %v928_v33 = vadd.f32 %v912_v40, %v896_v39  ;;  %v919_v60 = vadd.f32 %v903_v44, %v887_v6  ;;  %v898_v22 = vmul.f32 %v882_v50, %v2511_v59  ;;  %v1331_v59 = vld [vmem:[#allocation2 + $0x40] sm:$0xff]  ;;  %v892_v51 = vmul.f32 %v876_v5, %v2522_v18 }
 0x2d8   :  { %v1347_v4 = vld [vmem:[#allocation3 + $0x40] sm:$0xff] }
 0x2d9   :  { %1670 = vlog2.f32 %v1347_v4  ;;  %944 = vst.msk [vmem:[#allocation3 + $0x58] sm:$0xff] %vm3094_vm3, %v928_v33  ;;  %v858_v0 = vpop.xlane.xlu0 %857  ;;  %vm3105_vm3 = vmmov %vm3073_vm0  ;;  %v884_v33 = vld [vmem:[#allocation3 + $0x78] sm:$0xff] }
 0x2da   :  { %935 = vst.msk [vmem:[#allocation3 + $0x10] sm:$0xff] %vm3095_vm5, %v919_v60  ;;  %v911_v57 = vsel %vm3096_vm2, %v858_v0, 0.0  ;;  %vm3107_vm5 = vcmp.gt.f32.partialorder %v3106_v19, -inf  ;;  %vm3108_vm2 = vmmov %vm3073_vm0  ;;  %v875_v60 = vld [vmem:[#allocation3 + $0x30] sm:$0xff]  ;;  %v900_v14 = vmul.f32 %v884_v33, %v2534_v61  ;;  %v265_v33 = vld [vmem:[#allocation4 + $0x78] sm:$0xff] }
 0x2db   :  { %v1665_v41 = vpop.eup %1664  ;;  %v927_v3 = vadd.f32 %v911_v57, %v895_v49 }
 0x2dc   :  { %v1667_v28 = vpop.eup %1666  ;;  %v1358_v23 = vmul.f32 0.6931472, %v1665_v41  ;;  %v1342_v17 = vld [vmem:[#allocation3 + $0x18] sm:$0xff] }
 0x2dd   :  { %v1374_v46 = vmul.f32 0.6931472, %v1667_v28  ;;  %1672 = vlog2.f32 %v1342_v17  ;;  %943 = vst.msk [vmem:[#allocation3 + $0x50] sm:$0xff] %vm3097_vm1, %v927_v3  ;;  %v848_v30 = vpop.xlane.xlu1 %847  ;;  %vm3109_vm1 = vmmov %vm3073_vm0  ;;  %v1334_v3 = vld [vmem:[#allocation2 + $0x58] sm:$0xff] }
 0x2de   :  { %v1388_v16 = vadd.f32 %v1358_v23, %v1324_v20  ;;  %v906_v32 = vsel %vm3098_vm7, %v848_v30, 0.0  ;;  %vm3110_vm7 = vmmov %vm3073_vm0  ;;  %v891_v23 = vmul.f32 %v875_v60, %v2529_v38  ;;  %v1325_v20 = vld [vmem:[#allocation2 + $0x10] sm:$0xff]  ;;  %v262_v60 = vld [vmem:[#allocation4 + $0x60] sm:$0xff] }
 0x2df   :  { %v1396_v45 = vadd.f32 %v1374_v46, %v1332_v58  ;;  %v922_v8 = vadd.f32 %v906_v32, %v890_v24 }
 0x2e0   :  { %v1669_v54 = vpop.eup %1668  ;;  %1404 = vst.msk [vmem:[%s2833_s3 + $0x8] sm:$0xff] %vm3099_vm6, %v1388_v16  ;;  %v1350_v48 = vld [vmem:[#allocation3 + $0x58] sm:$0xff]  ;;  %vm3111_vm6 = vmmov %vm3073_vm0  ;;  %v883_v16 = vld [vmem:[#allocation3 + $0x70] sm:$0xff] }
 0x2e1   :  { %v1341_v11 = vld [vmem:[#allocation3 + $0x10] sm:$0xff]  ;;  %1412 = vst.msk [vmem:[%s2833_s3 + $0x48] sm:$0xff] %vm3073_vm0, %v1396_v45  ;;  %v1356_v63 = vmul.f32 0.6931472, %v1669_v54  ;;  %1674 = vlog2.f32 %v1350_v48  ;;  %v864_v62 = vpop.xlane.xlu1 %863  ;;  %v846_v1 = vpop.xlane.xlu0 %845  ;;  %v899_v48 = vmul.f32 %v883_v16, %v2539_v55  ;;  %v1328_v55 = vld [vmem:[#allocation2 + $0x28] sm:$0xff] }
 0x2e2   :  { %938 = vst.msk [vmem:[#allocation3 + $0x28] sm:$0xff] %vm3100_vm9, %v922_v8  ;;  %1676 = vlog2.f32 %v1341_v11  ;;  %v914_v25 = vsel %vm3101_vm11, %v864_v62, 0.0  ;;  %v905_v26 = vsel %vm3102_vm8, %v846_v1, 0.0  ;;  %v259_v8 = vld [vmem:[#allocation4 + $0x48] sm:$0xff]  ;;  %v1333_v54 = vld [vmem:[#allocation2 + $0x50] sm:$0xff]  ;;  %vm3116_vm9 = vmmov %vm3073_vm0 }
 0x2e3   :  { %v1671_v21 = vpop.eup %1670  ;;  %v1387_v12 = vadd.f32 %v1356_v63, %v1323_v15  ;;  %v930_v43 = vadd.f32 %v914_v25, %v898_v22  ;;  %v921_v7 = vadd.f32 %v905_v26, %v889_v29  ;;  %v261_v15 = vld [vmem:[#allocation4 + $0x58] sm:$0xff]  ;;  %v258_v25 = vld [vmem:[#allocation4 + $0x40] sm:$0xff]  ;;  %vm3117_vm11 = vmmov %vm3073_vm0 }
 0x2e4   :  { %v1372_v56 = vmul.f32 0.6931472, %v1671_v21  ;;  %v1349_v52 = vld [vmem:[#allocation3 + $0x50] sm:$0xff]  ;;  %vm3118_vm8 = vmmov %vm3073_vm0 }
 0x2e5   :  { %1403 = vst.msk [vmem:[%s2833_s3] sm:$0xff] %vm3103_vm4, %v1387_v12  ;;  %1678 = vlog2.f32 %v1349_v52  ;;  %v862_v27 = vpop.xlane.xlu0 %861  ;;  %v263_v52 = vld [vmem:[#allocation4 + $0x68] sm:$0xff]  ;;  %vm3120_vm4 = vmmov %vm3073_vm0 }
 0x2e6   :  { %946 = vst.msk [vmem:[#allocation3 + $0x68] sm:$0xff] %vm3104_vm14, %v930_v43  ;;  %v1395_v34 = vadd.f32 %v1372_v56, %v1331_v59  ;;  %v913_v35 = vsel %vm3107_vm5, %v862_v27, 0.0  ;;  %v260_v59 = vld [vmem:[#allocation4 + $0x50] sm:$0xff]  ;;  %vm3121_vm14 = vmmov %vm3073_vm0 }
 0x2e7   :  { %937 = vst.msk [vmem:[#allocation3 + $0x20] sm:$0xff] %vm3105_vm3, %v921_v7  ;;  %v1673_v36 = vpop.eup %1672  ;;  %v929_v39 = vadd.f32 %v913_v35, %v897_v53  ;;  %v1336_v35 = vld [vmem:[#allocation2 + $0x68] sm:$0xff]  ;;  %vm3122_vm3 = vmmov %vm3073_vm0 }
 0x2e8   :  { %1411 = vst.msk [vmem:[%s2833_s3 + $0x40] sm:$0xff] %vm3108_vm2, %v1395_v34  ;;  %v1362_v2 = vmul.f32 0.6931472, %v1673_v36  ;;  %vm3123_vm5 = vmmov %vm3073_vm0 }
 0x2e9   :  { %v1344_v6 = vld [vmem:[#allocation3 + $0x28] sm:$0xff]  ;;  %945 = vst.msk [vmem:[#allocation3 + $0x60] sm:$0xff] %vm3109_vm1, %v929_v39  ;;  %v852_v40 = vpop.xlane.xlu1 %851  ;;  %vm3124_vm2 = vmmov %vm3073_vm0 }
 0x2ea   :  { %1680 = vlog2.f32 %v1344_v6  ;;  %v1390_v44 = vadd.f32 %v1362_v2, %v1326_v31  ;;  %v908_v13 = vsel %vm636_vm12, %v852_v40, 0.0  ;;  %vm3113_vm12 = vmmov %vm3073_vm0  ;;  %v1327_v2 = vld [vmem:[#allocation2 + $0x20] sm:$0xff] }
 0x2eb   :  { %v1675_v4 = vpop.eup %1674  ;;  %v924_v49 = vadd.f32 %v908_v13, %v892_v51  ;;  %vm3125_vm1 = vmmov %vm3073_vm0 }
 0x2ec   :  { %v1677_v0 = vpop.eup %1676  ;;  %1406 = vst.msk [vmem:[%s2833_s3 + $0x18] sm:$0xff] %vm3110_vm7, %v1390_v44  ;;  %v1378_v57 = vmul.f32 0.6931472, %v1675_v4  ;;  %vm3126_vm7 = vmmov %vm3073_vm0 }
 0x2ed   :  { %v1352_v47 = vld [vmem:[#allocation3 + $0x68] sm:$0xff]  ;;  %v1360_v18 = vmul.f32 0.6931472, %v1677_v0  ;;  %940 = vst.msk [vmem:[#allocation3 + $0x38] sm:$0xff] %vm3111_vm6, %v924_v49  ;;  %v868_v28 = vpop.xlane.xlu1 %867  ;;  %v850_v17 = vpop.xlane.xlu0 %849  ;;  %v1335_v0 = vld [vmem:[#allocation2 + $0x60] sm:$0xff]  ;;  %vm3127_vm6 = vmmov %vm3073_vm0 }
 0x2ee   :  { %v1343_v41 = vld [vmem:[#allocation3 + $0x20] sm:$0xff]  ;;  %1682 = vlog2.f32 %v1352_v47  ;;  %v1398_v46 = vadd.f32 %v1378_v57, %v1334_v3  ;;  %v916_v24 = vsel %vm644_vm13, %v868_v28, 0.0  ;;  %v907_v58 = vsel %vm635_vm15, %v850_v17, 0.0  ;;  %vm3114_vm15 = vmmov %vm3073_vm0  ;;  %v264_v17 = vld [vmem:[#allocation4 + $0x70] sm:$0xff] }
 0x2ef   :  { %1684 = vlog2.f32 %v1343_v41  ;;  %v1679_v32 = vpop.eup %1678  ;;  %v1389_v50 = vadd.f32 %v1360_v18, %v1325_v20  ;;  %v932_v42 = vadd.f32 %v916_v24, %v900_v14  ;;  %v923_v45 = vadd.f32 %v907_v58, %v891_v23  ;;  %vm3115_vm13 = vmmov %vm3073_vm0 }
 0x2f0   :  { %1414 = vst.msk [vmem:[%s2833_s3 + $0x58] sm:$0xff] %vm3113_vm12, %v1398_v46  ;;  %v1376_v61 = vmul.f32 0.6931472, %v1679_v32  ;;  %v1351_v38 = vld [vmem:[#allocation3 + $0x60] sm:$0xff]  ;;  %vm3128_vm12 = vmmov %vm3073_vm0  ;;  %v1330_v46 = vld [vmem:[#allocation2 + $0x38] sm:$0xff] }
 0x2f1   :  { %1405 = vst.msk [vmem:[%s2833_s3 + $0x10] sm:$0xff] %vm3073_vm0, %v1389_v50  ;;  %1686 = vlog2.f32 %v1351_v38  ;;  %v425_v10 = vpop.xlane.xlu1 %424  ;;  %v866_v11 = vpop.xlane.xlu0 %865  ;;  %v1329_v38 = vld [vmem:[#allocation2 + $0x30] sm:$0xff] }
 0x2f2   :  { %948 = vst.msk [vmem:[#allocation3 + $0x78] sm:$0xff] %vm3114_vm15, %v932_v42  ;;  %v1397_v63 = vadd.f32 %v1376_v61, %v1333_v54  ;;  %v447_v22 = vadd.f32 %v425_v10, %v259_v8  ;;  %v915_v62 = vsel %vm643_vm10, %v866_v11, 0.0  ;;  %vm3119_vm10 = vmmov %vm3073_vm0  ;;  %v1338_v8 = vld [vmem:[#allocation2 + $0x78] sm:$0xff] }
 0x2f3   :  { %939 = vst.msk [vmem:[#allocation3 + $0x30] sm:$0xff] %vm3115_vm13, %v923_v45  ;;  %v931_v1 = vadd.f32 %v915_v62, %v899_v48  ;;  %vm3129_vm15 = vmmov %vm3073_vm0  ;;  %v1337_v62 = vld [vmem:[#allocation2 + $0x70] sm:$0xff] }
 0x2f4   :  { %v1681_v29 = vpop.eup %1680  ;;  %1413 = vst.msk [vmem:[%s2833_s3 + $0x50] sm:$0xff] %vm3116_vm9, %v1397_v63  ;;  %v1346_v37 = vld [vmem:[#allocation3 + $0x38] sm:$0xff]  ;;  %vm3130_vm13 = vmmov %vm3073_vm0 }
 0x2f5   :  { %v1366_v26 = vmul.f32 0.6931472, %v1681_v29  ;;  %464 = vst.msk [vmem:[#allocation4 + $0x48] sm:$0xff] %vm3117_vm11, %v447_v22  ;;  %1688 = vlog2.f32 %v1346_v37  ;;  %v429_v21 = vpop.xlane.xlu1 %428  ;;  %v423_v9 = vpop.xlane.xlu0 %422  ;;  %vm3131_vm9 = vmmov %vm3073_vm0 }
 0x2f6   :  { %947 = vst.msk [vmem:[#allocation3 + $0x70] sm:$0xff] %vm3118_vm8, %v931_v1  ;;  %v449_v43 = vadd.f32 %v429_v21, %v261_v15  ;;  %v446_v7 = vadd.f32 %v423_v9, %v258_v25  ;;  %vm3132_vm11 = vmmov %vm3073_vm0 }
 0x2f7   :  { %v1392_v12 = vadd.f32 %v1366_v26, %v1328_v55  ;;  %vm3133_vm8 = vmmov %vm3073_vm0 }
 0x2f8   :  { %v1683_v56 = vpop.eup %1682  ;;  %466 = vst.msk [vmem:[#allocation4 + $0x58] sm:$0xff] %vm3120_vm4, %v449_v43  ;;  %vm3135_vm4 = vmmov %vm3073_vm0 }
 0x2f9   :  { %v1685_v53 = vpop.eup %1684  ;;  %1408 = vst.msk [vmem:[%s2833_s3 + $0x28] sm:$0xff] %vm3119_vm10, %v1392_v12  ;;  %v1382_v27 = vmul.f32 0.6931472, %v1683_v56  ;;  %v1354_v34 = vld [vmem:[#allocation3 + $0x78] sm:$0xff]  ;;  %v433_v36 = vpop.xlane.xlu1 %432  ;;  %vm3134_vm10 = vmmov %vm3073_vm0 }
 0x2fa   :  { %v1345_v19 = vld [vmem:[#allocation3 + $0x30] sm:$0xff]  ;;  %463 = vst.msk [vmem:[#allocation4 + $0x40] sm:$0xff] %vm3121_vm14, %v446_v7  ;;  %v1364_v5 = vmul.f32 0.6931472, %v1685_v53  ;;  %1690 = vlog2.f32 %v1354_v34  ;;  %v427_v39 = vpop.xlane.xlu0 %426  ;;  %v451_v31 = vadd.f32 %v433_v36, %v263_v52  ;;  %vm3136_vm14 = vmmov %vm3073_vm0 }
 0x2fb   :  { %v1400_v6 = vadd.f32 %v1382_v27, %v1336_v35  ;;  %1692 = vlog2.f32 %v1345_v19  ;;  %v448_v51 = vadd.f32 %v427_v39, %v260_v59  ;;  %v1687_v40 = vpop.eup %1686 }
 0x2fc   :  { %v1391_v44 = vadd.f32 %v1364_v5, %v1327_v2  ;;  %v1428_v13 = vld [vmem:[#allocation4 + $0x48] sm:$0xff]  ;;  %v1380_v4 = vmul.f32 0.6931472, %v1687_v40  ;;  %468 = vst.msk [vmem:[#allocation4 + $0x68] sm:$0xff] %vm3124_vm2, %v451_v31  ;;  %vm3139_vm2 = vmmov %vm3073_vm0 }
 0x2fd   :  { %1416 = vst.msk [vmem:[%s2833_s3 + $0x68] sm:$0xff] %vm3122_vm3, %v1400_v6  ;;  %v1353_v49 = vld [vmem:[#allocation3 + $0x70] sm:$0xff]  ;;  %v437_v57 = vpop.xlane.xlu1 %436  ;;  %vm3137_vm3 = vmmov %vm3073_vm0 }
 0x2fe   :  { %1444 = vst.msk [vmem:[%s2832_s4 + $0x48] sm:$0xff] %vm3123_vm5, %v1428_v13  ;;  %1694 = vlog2.f32 %v1353_v49  ;;  %v431_v47 = vpop.xlane.xlu0 %430  ;;  %v1399_v41 = vadd.f32 %v1380_v4, %v1335_v0  ;;  %v453_v3 = vadd.f32 %v437_v57, %v265_v33  ;;  %vm3138_vm5 = vmmov %vm3073_vm0 }
 0x2ff   :  { %465 = vst.msk [vmem:[#allocation4 + $0x50] sm:$0xff] %vm3125_vm1, %v448_v51  ;;  %v450_v18 = vadd.f32 %v431_v47, %v262_v60  ;;  %v1689_v14 = vpop.eup %1688  ;;  %v1430_v28 = vld [vmem:[#allocation4 + $0x58] sm:$0xff]  ;;  %vm3140_vm1 = vmmov %vm3073_vm0 }
 0x300   :  { %1407 = vst.msk [vmem:[%s2833_s3 + $0x20] sm:$0xff] %vm3126_vm7, %v1391_v44  ;;  %v1370_v20 = vmul.f32 0.6931472, %v1689_v14 }
 0x301   :  { %v1427_v23 = vld [vmem:[#allocation4 + $0x40] sm:$0xff]  ;;  %1415 = vst.msk [vmem:[%s2833_s3 + $0x60] sm:$0xff] %vm3127_vm6, %v1399_v41 }
 0x302   :  { %1446 = vst.msk [vmem:[%s2832_s4 + $0x58] sm:$0xff] %vm3128_vm12, %v1430_v28  ;;  %v435_v24 = vpop.xlane.xlu0 %434  ;;  %v1394_v30 = vadd.f32 %v1370_v20, %v1330_v46 }
 0x303   :  { %1443 = vst.msk [vmem:[%s2832_s4 + $0x40] sm:$0xff] %vm3073_vm0, %v1427_v23  ;;  %v452_v58 = vadd.f32 %v435_v24, %v264_v17  ;;  %v1432_v32 = vld [vmem:[#allocation4 + $0x68] sm:$0xff] }
 0x304   :  { %470 = vst.msk [vmem:[#allocation4 + $0x78] sm:$0xff] %vm3129_vm15, %v453_v3  ;;  %v1691_v16 = vpop.eup %1690 }
 0x305   :  { %467 = vst.msk [vmem:[#allocation4 + $0x60] sm:$0xff] %vm3130_vm13, %v450_v18  ;;  %v1693_v42 = vpop.eup %1692  ;;  %v1386_v45 = vmul.f32 0.6931472, %v1691_v16 }
 0x306   :  { %v1429_v50 = vld [vmem:[#allocation4 + $0x50] sm:$0xff]  ;;  %1410 = vst.msk [vmem:[%s2833_s3 + $0x38] sm:$0xff] %vm3131_vm9, %v1394_v30  ;;  %v1368_v61 = vmul.f32 0.6931472, %v1693_v42 }
 0x307   :  { %1448 = vst.msk [vmem:[%s2832_s4 + $0x68] sm:$0xff] %vm3132_vm11, %v1432_v32  ;;  %v1402_v54 = vadd.f32 %v1386_v45, %v1338_v8 }
 0x308   :  { %1445 = vst.msk [vmem:[%s2832_s4 + $0x50] sm:$0xff] %vm3133_vm8, %v1429_v50  ;;  %v1695_v10 = vpop.eup %1694  ;;  %v1393_v48 = vadd.f32 %v1368_v61, %v1329_v38 }
 0x309   :  { %469 = vst.msk [vmem:[#allocation4 + $0x70] sm:$0xff] %vm3134_vm10, %v452_v58  ;;  %v1384_v22 = vmul.f32 0.6931472, %v1695_v10 }
 0x30a   :  { %1418 = vst.msk [vmem:[%s2833_s3 + $0x78] sm:$0xff] %vm3135_vm4, %v1402_v54 }
 0x30b   :  { %v1434_v11 = vld [vmem:[#allocation4 + $0x78] sm:$0xff]  ;;  %1409 = vst.msk [vmem:[%s2833_s3 + $0x30] sm:$0xff] %vm3138_vm5, %v1393_v48  ;;  %v1401_v29 = vadd.f32 %v1384_v22, %v1337_v62 }
 0x30c   :  { %v1431_v63 = vld [vmem:[#allocation4 + $0x60] sm:$0xff]  ;;  %1450 = vst.msk [vmem:[%s2832_s4 + $0x78] sm:$0xff] %vm3136_vm14, %v1434_v11 }
 0x30d   :  { %1447 = vst.msk [vmem:[%s2832_s4 + $0x60] sm:$0xff] %vm3137_vm3, %v1431_v63 }
 0x30e   :  { %1417 = vst.msk [vmem:[%s2833_s3 + $0x70] sm:$0xff] %vm3139_vm2, %v1401_v29 }
 0x310   :  { %v1433_v1 = vld [vmem:[#allocation4 + $0x70] sm:$0xff] }
 0x311   :  { %1449 = vst.msk [vmem:[%s2832_s4 + $0x70] sm:$0xff] %vm3140_vm1, %v1433_v1 }

</bundles_post_ra>
